<compile_context>
chip_gen: v6e
topology: v6e:2x2x1
jax: 0.10.0
libtpu: 0.0.40
codegen_flags: <defaults>
</compile_context>

<pallas_src>
import functools

import jax
import jax.numpy as jnp
from jax.experimental import pallas as pl
from jax.experimental.pallas import tpu as pltpu

nc = 3
ndf = 8                      # compact ndf for the synthetic model
LEAKY_SLOPE = 0.2
BN_EPS = 1e-5


# ----------------------------- Pallas kernels ------------------------------

def _conv_act_kernel(a_ref, w_ref, o_ref, *, act):
    """out (Cout, M) = W (Cout, K) @ A (K, M), fused activation epilogue."""
    y = jnp.dot(w_ref[...], a_ref[...], preferred_element_type=jnp.float32)
    if act == "leaky":
        y = jnp.where(y >= 0, y, LEAKY_SLOPE * y)
    elif act == "sigmoid":
        y = jax.nn.sigmoid(y)
    o_ref[...] = y.astype(o_ref.dtype)


def _conv_bn_leaky_kernel(a_ref, w_ref, g_ref, b_ref, o_ref):
    """Fused conv (as matmul) + training-mode BatchNorm + LeakyReLU(0.2).

    y:      (Cout, M) with M = N*OH*OW  -> per-channel stats are lane reductions.
    g_ref/b_ref: (Cout, 1) gamma / beta.
    """
    y = jnp.dot(w_ref[...], a_ref[...], preferred_element_type=jnp.float32)
    inv_m = 1.0 / y.shape[1]
    mean = jnp.sum(y, axis=1, keepdims=True) * inv_m
    d = y - mean
    var = jnp.sum(d * d, axis=1, keepdims=True) * inv_m      # biased (PyTorch train BN)
    scale = g_ref[...] * jax.lax.rsqrt(var + BN_EPS)
    yn = d * scale + b_ref[...]
    o_ref[...] = jnp.where(yn >= 0, yn, LEAKY_SLOPE * yn).astype(o_ref.dtype)


# ------------------------------ host wrappers -------------------------------

def _im2col_cm(x_cnhw, kh, kw, stride, pad):
    """Channels-major im2col.

    x_cnhw: (C, N, H, W)  ->  A: (K, M) with K = KH*KW*C (tap-major, then C)
    and M = N*OH*OW (row-major over n, oh, ow).
    """
    C, N, H, W = x_cnhw.shape
    xp = jnp.pad(x_cnhw, ((0, 0), (0, 0), (pad, pad), (pad, pad)))
    OH = (H + 2 * pad - kh) // stride + 1
    OW = (W + 2 * pad - kw) // stride + 1
    taps = []
    for i in range(kh):
        for j in range(kw):
            taps.append(xp[:, :,
                           i:i + stride * (OH - 1) + 1:stride,
                           j:j + stride * (OW - 1) + 1:stride])
    a = jnp.stack(taps, axis=0)                     # (KH*KW, C, N, OH, OW)
    return a.reshape(kh * kw * C, N * OH * OW), OH, OW


def _wmat(w):
    """PyTorch (Cout, Cin, KH, KW) -> (Cout, K) with K ordered (i, j, cin)."""
    co, ci, kh, kw = w.shape
    return jnp.transpose(w, (0, 2, 3, 1)).reshape(co, kh * kw * ci)


def conv_block(a_km, w_ck, gamma=None, beta=None, act="leaky"):
    """One fused pallas_call: conv-as-matmul (+BN) + activation, grid=(1,)."""
    K, M = a_km.shape
    cout = w_ck.shape[0]
    out_shape = jax.ShapeDtypeStruct((cout, M), jnp.float32)
    out_spec = pl.BlockSpec((cout, M), lambda i: (0, 0))
    cp = pltpu.CompilerParams(dimension_semantics=("arbitrary",))

    if gamma is None:
        return pl.pallas_call(
            functools.partial(_conv_act_kernel, act=act),
            out_shape=out_shape,
            grid=(1,),
            in_specs=[pl.BlockSpec((K, M), lambda i: (0, 0)),
                      pl.BlockSpec((cout, K), lambda i: (0, 0))],
            out_specs=out_spec,
            compiler_params=cp,
        )(a_km, w_ck)

    return pl.pallas_call(
        _conv_bn_leaky_kernel,
        out_shape=out_shape,
        grid=(1,),
        in_specs=[pl.BlockSpec((K, M), lambda i: (0, 0)),
                  pl.BlockSpec((cout, K), lambda i: (0, 0)),
                  pl.BlockSpec((cout, 1), lambda i: (0, 0)),
                  pl.BlockSpec((cout, 1), lambda i: (0, 0))],
        out_specs=out_spec,
        compiler_params=cp,
    )(a_km, w_ck, gamma.reshape(cout, 1), beta.reshape(cout, 1))


# ------------------------------ model definition ----------------------------

def init_params(key):
    ks = jax.random.split(key, 5)

    def w(k, cout, cin):
        # PyTorch Conv2d weight layout (Cout, Cin, KH, KW), DCGAN-style init.
        return 0.02 * jax.random.normal(k, (cout, cin, 4, 4), jnp.float32)

    return {
        "w1": w(ks[0], ndf, nc),
        "w2": w(ks[1], ndf * 2, ndf),
        "g2": jnp.ones((ndf * 2,), jnp.float32), "b2": jnp.zeros((ndf * 2,), jnp.float32),
        "w3": w(ks[2], ndf * 4, ndf * 2),
        "g3": jnp.ones((ndf * 4,), jnp.float32), "b3": jnp.zeros((ndf * 4,), jnp.float32),
        "w4": w(ks[3], ndf * 8, ndf * 4),
        "g4": jnp.ones((ndf * 8,), jnp.float32), "b4": jnp.zeros((ndf * 8,), jnp.float32),
        "w5": w(ks[4], 1, ndf * 8),
    }


@jax.jit
def discriminator_forward(params, x_nchw):
    N = x_nchw.shape[0]
    x = jnp.transpose(x_nchw, (1, 0, 2, 3))                 # NCHW -> (C, N, H, W)

    # Block 1: Conv(3 -> ndf, 4, s2, p1) + LeakyReLU
    a, oh, ow = _im2col_cm(x, 4, 4, 2, 1)
    y = conv_block(a, _wmat(params["w1"]), act="leaky")
    x = y.reshape(-1, N, oh, ow)

    # Blocks 2-4: Conv + BatchNorm + LeakyReLU (fully fused per block)
    for wk, gk, bk in (("w2", "g2", "b2"), ("w3", "g3", "b3"), ("w4", "g4", "b4")):
        a, oh, ow = _im2col_cm(x, 4, 4, 2, 1)
        y = conv_block(a, _wmat(params[wk]), gamma=params[gk], beta=params[bk])
        x = y.reshape(-1, N, oh, ow)

    # Block 5: Conv(ndf*8 -> 1, 4, s1, p0) + Sigmoid
    a, _, _ = _im2col_cm(x, 4, 4, 1, 0)
    y = conv_block(a, _wmat(params["w5"]), act="sigmoid")    # (1, N)
    return jnp.transpose(y, (1, 0)).reshape(N, 1, 1, 1)      # (N, 1, 1, 1) NCHW


# ------------------------------- JAX reference -------------------------------

def discriminator_reference(params, x):
    def conv(v, w, stride, pad):
        return jax.lax.conv_general_dilated(
            v, w, (stride, stride), ((pad, pad), (pad, pad)),
            dimension_numbers=("NCHW", "OIHW", "NCHW"))

    def leaky(v):
        return jnp.where(v >= 0, v, LEAKY_SLOPE * v)

    def bn_leaky(v, g, b):
        mean = jnp.mean(v, axis=(0, 2, 3), keepdims=True)
        var = jnp.mean((v - mean) ** 2, axis=(0, 2, 3), keepdims=True)
        vn = (v - mean) * jax.lax.rsqrt(var + BN_EPS)
        return leaky(vn * g.reshape(1, -1, 1, 1) + b.reshape(1, -1, 1, 1))

    x = leaky(conv(x, params["w1"], 2, 1))
    x = bn_leaky(conv(x, params["w2"], 2, 1), params["g2"], params["b2"])
    x = bn_leaky(conv(x, params["w3"], 2, 1), params["g3"], params["b3"])
    x = bn_leaky(conv(x, params["w4"], 2, 1), params["g4"], params["b4"])
    x = jax.nn.sigmoid(conv(x, params["w5"], 1, 0))
    return x


if __name__ == "__main__":
    key = jax.random.PRNGKey(0)
    pkey, xkey = jax.random.split(key)
    params = init_params(pkey)

    # Batch=2, nc=3, 64x64 spatial (required by the 5-conv DCGAN head -> 1x1).
    x = jax.random.normal(xkey, (2, nc, 64, 64), jnp.float32)      # NCHW like PyTorch

    out = discriminator_forward(params, x)
    out = jax.block_until_ready(out)
    assert out.shape == (2, 1, 1, 1), out.shape

    ref = discriminator_reference(params, x)
    if not jnp.allclose(out, ref, atol=2e-4, rtol=1e-3):
        raise AssertionError("Pallas result does not match JAX reference")

    print("KERNEL_OK")
</pallas_src>

<mosaic_0001>
module attributes {stable_mosaic.version = 11 : i64} {
  func.func @_conv_act_kernel(%arg0: i32, %arg1: memref<48x2048xf32, #tpu.memory_space<vmem>>, %arg2: memref<8x48xf32, #tpu.memory_space<vmem>>, %arg3: memref<8x2048xf32, #tpu.memory_space<vmem>>) attributes {dimension_semantics = [#tpu.dimension_semantics<arbitrary>], iteration_bounds = array<i64: 1>, scalar_prefetch = 0 : i64, scratch_operands = 0 : i64, tpu.core_type = #tpu.core_type<tc>, window_params = [{pipeline_mode = #tpu.pipeline_mode<synchronous>, transform_indices = @transform_0, window_bounds = array<i64: 48, 2048>}, {pipeline_mode = #tpu.pipeline_mode<synchronous>, transform_indices = @transform_1, window_bounds = array<i64: 8, 48>}, {pipeline_mode = #tpu.pipeline_mode<synchronous>, transform_indices = @transform_2, window_bounds = array<i64: 8, 2048>}]} {
    %c0 = arith.constant 0 : index
    %c0_0 = arith.constant 0 : index
    %0 = vector.load %arg2[%c0, %c0_0] : memref<8x48xf32, #tpu.memory_space<vmem>>, vector<8x48xf32>
    %c0_1 = arith.constant 0 : index
    %c0_2 = arith.constant 0 : index
    %1 = vector.load %arg1[%c0_1, %c0_2] : memref<48x2048xf32, #tpu.memory_space<vmem>>, vector<48x2048xf32>
    %cst = arith.constant dense<0.000000e+00> : vector<8x2048xf32>
    %2 = tpu.matmul %0, %1, %cst {dimension_numbers = #tpu.dot_dimension_numbers<[1], [0], [0], [1], [0, 0, 1, 1], [], []>} : vector<8x48xf32>, vector<48x2048xf32>, vector<8x2048xf32> -> vector<8x2048xf32>
    %cst_3 = arith.constant 0.000000e+00 : f32
    %3 = vector.broadcast %cst_3 : f32 to vector<8x2048xf32>
    %4 = arith.cmpf oge, %2, %3 : vector<8x2048xf32>
    %cst_4 = arith.constant 2.000000e-01 : f32
    %5 = vector.broadcast %cst_4 : f32 to vector<8x2048xf32>
    %6 = arith.mulf %5, %2 : vector<8x2048xf32>
    %7 = arith.select %4, %2, %6 : vector<8x2048xi1>, vector<8x2048xf32>
    %c0_5 = arith.constant 0 : index
    %c0_6 = arith.constant 0 : index
    %8 = vector.load %arg3[%c0_5, %c0_6] : memref<8x2048xf32, #tpu.memory_space<vmem>>, vector<8x2048xf32>
    tpu.vector_store %arg3[%c0_5, %c0_6], %7 {strides = array<i32>} : memref<8x2048xf32, #tpu.memory_space<vmem>>, vector<8x2048xf32>,
    return
  }
  func.func @transform_0(%arg0: i32) -> (i32, i32) {
    %c0_i32 = arith.constant 0 : i32
    %c0_i32_0 = arith.constant 0 : i32
    %c0_i32_1 = arith.constant 0 : i32
    return %c0_i32, %c0_i32_0 : i32, i32
  }
  func.func @transform_1(%arg0: i32) -> (i32, i32) {
    %c0_i32 = arith.constant 0 : i32
    %c0_i32_0 = arith.constant 0 : i32
    %c0_i32_1 = arith.constant 0 : i32
    return %c0_i32, %c0_i32_0 : i32, i32
  }
  func.func @transform_2(%arg0: i32) -> (i32, i32) {
    %c0_i32 = arith.constant 0 : i32
    %c0_i32_0 = arith.constant 0 : i32
    %c0_i32_1 = arith.constant 0 : i32
    return %c0_i32, %c0_i32_0 : i32, i32
  }
}

module attributes {stable_mosaic.version = 11 : i64} {
  func.func @_conv_bn_leaky_kernel(%arg0: i32, %arg1: memref<128x512xf32, #tpu.memory_space<vmem>>, %arg2: memref<16x128xf32, #tpu.memory_space<vmem>>, %arg3: memref<16x1xf32, #tpu.memory_space<vmem>>, %arg4: memref<16x1xf32, #tpu.memory_space<vmem>>, %arg5: memref<16x512xf32, #tpu.memory_space<vmem>>) attributes {dimension_semantics = [#tpu.dimension_semantics<arbitrary>], iteration_bounds = array<i64: 1>, scalar_prefetch = 0 : i64, scratch_operands = 0 : i64, tpu.core_type = #tpu.core_type<tc>, window_params = [{pipeline_mode = #tpu.pipeline_mode<synchronous>, transform_indices = @transform_0, window_bounds = array<i64: 128, 512>}, {pipeline_mode = #tpu.pipeline_mode<synchronous>, transform_indices = @transform_1, window_bounds = array<i64: 16, 128>}, {pipeline_mode = #tpu.pipeline_mode<synchronous>, transform_indices = @transform_2, window_bounds = array<i64: 16, 1>}, {pipeline_mode = #tpu.pipeline_mode<synchronous>, transform_indices = @transform_3, window_bounds = array<i64: 16, 1>}, {pipeline_mode = #tpu.pipeline_mode<synchronous>, transform_indices = @transform_4, window_bounds = array<i64: 16, 512>}]} {
    %c0 = arith.constant 0 : index
    %c0_0 = arith.constant 0 : index
    %0 = vector.load %arg2[%c0, %c0_0] : memref<16x128xf32, #tpu.memory_space<vmem>>, vector<16x128xf32>
    %c0_1 = arith.constant 0 : index
    %c0_2 = arith.constant 0 : index
    %1 = vector.load %arg1[%c0_1, %c0_2] : memref<128x512xf32, #tpu.memory_space<vmem>>, vector<128x512xf32>
    %cst = arith.constant dense<0.000000e+00> : vector<16x512xf32>
    %2 = tpu.matmul %0, %1, %cst {dimension_numbers = #tpu.dot_dimension_numbers<[1], [0], [0], [1], [0, 0, 1, 1], [], []>} : vector<16x128xf32>, vector<128x512xf32>, vector<16x512xf32> -> vector<16x512xf32>
    %cst_3 = arith.constant dense<0.000000e+00> : vector<16xf32>
    %3 = vector.multi_reduction <add>, %2, %cst_3 [1] : vector<16x512xf32> to vector<16xf32>
    %4 = vector.shape_cast %3 : vector<16xf32> to vector<16x1xf32>
    %cst_4 = arith.constant 0.001953125 : f32
    %5 = vector.broadcast %cst_4 : f32 to vector<16x1xf32>
    %6 = arith.mulf %4, %5 : vector<16x1xf32>
    %7 = vector.broadcast %6 : vector<16x1xf32> to vector<16x512xf32>
    %8 = arith.subf %2, %7 : vector<16x512xf32>
    %9 = arith.mulf %8, %8 : vector<16x512xf32>
    %cst_5 = arith.constant dense<0.000000e+00> : vector<16xf32>
    %10 = vector.multi_reduction <add>, %9, %cst_5 [1] : vector<16x512xf32> to vector<16xf32>
    %11 = vector.shape_cast %10 : vector<16xf32> to vector<16x1xf32>
    %cst_6 = arith.constant 0.001953125 : f32
    %12 = vector.broadcast %cst_6 : f32 to vector<16x1xf32>
    %13 = arith.mulf %11, %12 : vector<16x1xf32>
    %c0_7 = arith.constant 0 : index
    %c0_8 = arith.constant 0 : index
    %14 = vector.load %arg3[%c0_7, %c0_8] : memref<16x1xf32, #tpu.memory_space<vmem>>, vector<16x1xf32>
    %cst_9 = arith.constant 9.99999974E-6 : f32
    %15 = vector.broadcast %cst_9 : f32 to vector<16x1xf32>
    %16 = arith.addf %13, %15 : vector<16x1xf32>
    %17 = math.rsqrt %16 : vector<16x1xf32>
    %18 = arith.mulf %14, %17 : vector<16x1xf32>
    %19 = vector.broadcast %18 : vector<16x1xf32> to vector<16x512xf32>
    %20 = arith.mulf %8, %19 : vector<16x512xf32>
    %c0_10 = arith.constant 0 : index
    %c0_11 = arith.constant 0 : index
    %21 = vector.load %arg4[%c0_10, %c0_11] : memref<16x1xf32, #tpu.memory_space<vmem>>, vector<16x1xf32>
    %22 = vector.broadcast %21 : vector<16x1xf32> to vector<16x512xf32>
    %23 = arith.addf %20, %22 : vector<16x512xf32>
    %cst_12 = arith.constant 0.000000e+00 : f32
    %24 = vector.broadcast %cst_12 : f32 to vector<16x512xf32>
    %25 = arith.cmpf oge, %23, %24 : vector<16x512xf32>
    %cst_13 = arith.constant 2.000000e-01 : f32
    %26 = vector.broadcast %cst_13 : f32 to vector<16x512xf32>
    %27 = arith.mulf %26, %23 : vector<16x512xf32>
    %28 = arith.select %25, %23, %27 : vector<16x512xi1>, vector<16x512xf32>
    %c0_14 = arith.constant 0 : index
    %c0_15 = arith.constant 0 : index
    %29 = vector.load %arg5[%c0_14, %c0_15] : memref<16x512xf32, #tpu.memory_space<vmem>>, vector<16x512xf32>
    tpu.vector_store %arg5[%c0_14, %c0_15], %28 {strides = array<i32>} : memref<16x512xf32, #tpu.memory_space<vmem>>, vector<16x512xf32>,
    return
  }
  func.func @transform_0(%arg0: i32) -> (i32, i32) {
    %c0_i32 = arith.constant 0 : i32
    %c0_i32_0 = arith.constant 0 : i32
    %c0_i32_1 = arith.constant 0 : i32
    return %c0_i32, %c0_i32_0 : i32, i32
  }
  func.func @transform_1(%arg0: i32) -> (i32, i32) {
    %c0_i32 = arith.constant 0 : i32
    %c0_i32_0 = arith.constant 0 : i32
    %c0_i32_1 = arith.constant 0 : i32
    return %c0_i32, %c0_i32_0 : i32, i32
  }
  func.func @transform_2(%arg0: i32) -> (i32, i32) {
    %c0_i32 = arith.constant 0 : i32
    %c0_i32_0 = arith.constant 0 : i32
    %c0_i32_1 = arith.constant 0 : i32
    return %c0_i32, %c0_i32_0 : i32, i32
  }
  func.func @transform_3(%arg0: i32) -> (i32, i32) {
    %c0_i32 = arith.constant 0 : i32
    %c0_i32_0 = arith.constant 0 : i32
    %c0_i32_1 = arith.constant 0 : i32
    return %c0_i32, %c0_i32_0 : i32, i32
  }
  func.func @transform_4(%arg0: i32) -> (i32, i32) {
    %c0_i32 = arith.constant 0 : i32
    %c0_i32_0 = arith.constant 0 : i32
    %c0_i32_1 = arith.constant 0 : i32
    return %c0_i32, %c0_i32_0 : i32, i32
  }
}

module attributes {stable_mosaic.version = 11 : i64} {
  func.func @_conv_bn_leaky_kernel(%arg0: i32, %arg1: memref<256x128xf32, #tpu.memory_space<vmem>>, %arg2: memref<32x256xf32, #tpu.memory_space<vmem>>, %arg3: memref<32x1xf32, #tpu.memory_space<vmem>>, %arg4: memref<32x1xf32, #tpu.memory_space<vmem>>, %arg5: memref<32x128xf32, #tpu.memory_space<vmem>>) attributes {dimension_semantics = [#tpu.dimension_semantics<arbitrary>], iteration_bounds = array<i64: 1>, scalar_prefetch = 0 : i64, scratch_operands = 0 : i64, tpu.core_type = #tpu.core_type<tc>, window_params = [{pipeline_mode = #tpu.pipeline_mode<synchronous>, transform_indices = @transform_0, window_bounds = array<i64: 256, 128>}, {pipeline_mode = #tpu.pipeline_mode<synchronous>, transform_indices = @transform_1, window_bounds = array<i64: 32, 256>}, {pipeline_mode = #tpu.pipeline_mode<synchronous>, transform_indices = @transform_2, window_bounds = array<i64: 32, 1>}, {pipeline_mode = #tpu.pipeline_mode<synchronous>, transform_indices = @transform_3, window_bounds = array<i64: 32, 1>}, {pipeline_mode = #tpu.pipeline_mode<synchronous>, transform_indices = @transform_4, window_bounds = array<i64: 32, 128>}]} {
    %c0 = arith.constant 0 : index
    %c0_0 = arith.constant 0 : index
    %0 = vector.load %arg2[%c0, %c0_0] : memref<32x256xf32, #tpu.memory_space<vmem>>, vector<32x256xf32>
    %c0_1 = arith.constant 0 : index
    %c0_2 = arith.constant 0 : index
    %1 = vector.load %arg1[%c0_1, %c0_2] : memref<256x128xf32, #tpu.memory_space<vmem>>, vector<256x128xf32>
    %cst = arith.constant dense<0.000000e+00> : vector<32x128xf32>
    %2 = tpu.matmul %0, %1, %cst {dimension_numbers = #tpu.dot_dimension_numbers<[1], [0], [0], [1], [0, 0, 1, 1], [], []>} : vector<32x256xf32>, vector<256x128xf32>, vector<32x128xf32> -> vector<32x128xf32>
    %cst_3 = arith.constant dense<0.000000e+00> : vector<32xf32>
    %3 = vector.multi_reduction <add>, %2, %cst_3 [1] : vector<32x128xf32> to vector<32xf32>
    %4 = vector.shape_cast %3 : vector<32xf32> to vector<32x1xf32>
    %cst_4 = arith.constant 7.812500e-03 : f32
    %5 = vector.broadcast %cst_4 : f32 to vector<32x1xf32>
    %6 = arith.mulf %4, %5 : vector<32x1xf32>
    %7 = vector.broadcast %6 : vector<32x1xf32> to vector<32x128xf32>
    %8 = arith.subf %2, %7 : vector<32x128xf32>
    %9 = arith.mulf %8, %8 : vector<32x128xf32>
    %cst_5 = arith.constant dense<0.000000e+00> : vector<32xf32>
    %10 = vector.multi_reduction <add>, %9, %cst_5 [1] : vector<32x128xf32> to vector<32xf32>
    %11 = vector.shape_cast %10 : vector<32xf32> to vector<32x1xf32>
    %cst_6 = arith.constant 7.812500e-03 : f32
    %12 = vector.broadcast %cst_6 : f32 to vector<32x1xf32>
    %13 = arith.mulf %11, %12 : vector<32x1xf32>
    %c0_7 = arith.constant 0 : index
    %c0_8 = arith.constant 0 : index
    %14 = vector.load %arg3[%c0_7, %c0_8] : memref<32x1xf32, #tpu.memory_space<vmem>>, vector<32x1xf32>
    %cst_9 = arith.constant 9.99999974E-6 : f32
    %15 = vector.broadcast %cst_9 : f32 to vector<32x1xf32>
    %16 = arith.addf %13, %15 : vector<32x1xf32>
    %17 = math.rsqrt %16 : vector<32x1xf32>
    %18 = arith.mulf %14, %17 : vector<32x1xf32>
    %19 = vector.broadcast %18 : vector<32x1xf32> to vector<32x128xf32>
    %20 = arith.mulf %8, %19 : vector<32x128xf32>
    %c0_10 = arith.constant 0 : index
    %c0_11 = arith.constant 0 : index
    %21 = vector.load %arg4[%c0_10, %c0_11] : memref<32x1xf32, #tpu.memory_space<vmem>>, vector<32x1xf32>
    %22 = vector.broadcast %21 : vector<32x1xf32> to vector<32x128xf32>
    %23 = arith.addf %20, %22 : vector<32x128xf32>
    %cst_12 = arith.constant 0.000000e+00 : f32
    %24 = vector.broadcast %cst_12 : f32 to vector<32x128xf32>
    %25 = arith.cmpf oge, %23, %24 : vector<32x128xf32>
    %cst_13 = arith.constant 2.000000e-01 : f32
    %26 = vector.broadcast %cst_13 : f32 to vector<32x128xf32>
    %27 = arith.mulf %26, %23 : vector<32x128xf32>
    %28 = arith.select %25, %23, %27 : vector<32x128xi1>, vector<32x128xf32>
    %c0_14 = arith.constant 0 : index
    %c0_15 = arith.constant 0 : index
    %29 = vector.load %arg5[%c0_14, %c0_15] : memref<32x128xf32, #tpu.memory_space<vmem>>, vector<32x128xf32>
    tpu.vector_store %arg5[%c0_14, %c0_15], %28 {strides = array<i32>} : memref<32x128xf32, #tpu.memory_space<vmem>>, vector<32x128xf32>,
    return
  }
  func.func @transform_0(%arg0: i32) -> (i32, i32) {
    %c0_i32 = arith.constant 0 : i32
    %c0_i32_0 = arith.constant 0 : i32
    %c0_i32_1 = arith.constant 0 : i32
    return %c0_i32, %c0_i32_0 : i32, i32
  }
  func.func @transform_1(%arg0: i32) -> (i32, i32) {
    %c0_i32 = arith.constant 0 : i32
    %c0_i32_0 = arith.constant 0 : i32
    %c0_i32_1 = arith.constant 0 : i32
    return %c0_i32, %c0_i32_0 : i32, i32
  }
  func.func @transform_2(%arg0: i32) -> (i32, i32) {
    %c0_i32 = arith.constant 0 : i32
    %c0_i32_0 = arith.constant 0 : i32
    %c0_i32_1 = arith.constant 0 : i32
    return %c0_i32, %c0_i32_0 : i32, i32
  }
  func.func @transform_3(%arg0: i32) -> (i32, i32) {
    %c0_i32 = arith.constant 0 : i32
    %c0_i32_0 = arith.constant 0 : i32
    %c0_i32_1 = arith.constant 0 : i32
    return %c0_i32, %c0_i32_0 : i32, i32
  }
  func.func @transform_4(%arg0: i32) -> (i32, i32) {
    %c0_i32 = arith.constant 0 : i32
    %c0_i32_0 = arith.constant 0 : i32
    %c0_i32_1 = arith.constant 0 : i32
    return %c0_i32, %c0_i32_0 : i32, i32
  }
}

module attributes {stable_mosaic.version = 11 : i64} {
  func.func @_conv_bn_leaky_kernel(%arg0: i32, %arg1: memref<512x32xf32, #tpu.memory_space<vmem>>, %arg2: memref<64x512xf32, #tpu.memory_space<vmem>>, %arg3: memref<64x1xf32, #tpu.memory_space<vmem>>, %arg4: memref<64x1xf32, #tpu.memory_space<vmem>>, %arg5: memref<64x32xf32, #tpu.memory_space<vmem>>) attributes {dimension_semantics = [#tpu.dimension_semantics<arbitrary>], iteration_bounds = array<i64: 1>, scalar_prefetch = 0 : i64, scratch_operands = 0 : i64, tpu.core_type = #tpu.core_type<tc>, window_params = [{pipeline_mode = #tpu.pipeline_mode<synchronous>, transform_indices = @transform_0, window_bounds = array<i64: 512, 32>}, {pipeline_mode = #tpu.pipeline_mode<synchronous>, transform_indices = @transform_1, window_bounds = array<i64: 64, 512>}, {pipeline_mode = #tpu.pipeline_mode<synchronous>, transform_indices = @transform_2, window_bounds = array<i64: 64, 1>}, {pipeline_mode = #tpu.pipeline_mode<synchronous>, transform_indices = @transform_3, window_bounds = array<i64: 64, 1>}, {pipeline_mode = #tpu.pipeline_mode<synchronous>, transform_indices = @transform_4, window_bounds = array<i64: 64, 32>}]} {
    %c0 = arith.constant 0 : index
    %c0_0 = arith.constant 0 : index
    %0 = vector.load %arg2[%c0, %c0_0] : memref<64x512xf32, #tpu.memory_space<vmem>>, vector<64x512xf32>
    %c0_1 = arith.constant 0 : index
    %c0_2 = arith.constant 0 : index
    %1 = vector.load %arg1[%c0_1, %c0_2] : memref<512x32xf32, #tpu.memory_space<vmem>>, vector<512x32xf32>
    %cst = arith.constant dense<0.000000e+00> : vector<64x32xf32>
    %2 = tpu.matmul %0, %1, %cst {dimension_numbers = #tpu.dot_dimension_numbers<[1], [0], [0], [1], [0, 0, 1, 1], [], []>} : vector<64x512xf32>, vector<512x32xf32>, vector<64x32xf32> -> vector<64x32xf32>
    %cst_3 = arith.constant dense<0.000000e+00> : vector<64xf32>
    %3 = vector.multi_reduction <add>, %2, %cst_3 [1] : vector<64x32xf32> to vector<64xf32>
    %4 = vector.shape_cast %3 : vector<64xf32> to vector<64x1xf32>
    %cst_4 = arith.constant 3.125000e-02 : f32
    %5 = vector.broadcast %cst_4 : f32 to vector<64x1xf32>
    %6 = arith.mulf %4, %5 : vector<64x1xf32>
    %7 = vector.broadcast %6 : vector<64x1xf32> to vector<64x32xf32>
    %8 = arith.subf %2, %7 : vector<64x32xf32>
    %9 = arith.mulf %8, %8 : vector<64x32xf32>
    %cst_5 = arith.constant dense<0.000000e+00> : vector<64xf32>
    %10 = vector.multi_reduction <add>, %9, %cst_5 [1] : vector<64x32xf32> to vector<64xf32>
    %11 = vector.shape_cast %10 : vector<64xf32> to vector<64x1xf32>
    %cst_6 = arith.constant 3.125000e-02 : f32
    %12 = vector.broadcast %cst_6 : f32 to vector<64x1xf32>
    %13 = arith.mulf %11, %12 : vector<64x1xf32>
    %c0_7 = arith.constant 0 : index
    %c0_8 = arith.constant 0 : index
    %14 = vector.load %arg3[%c0_7, %c0_8] : memref<64x1xf32, #tpu.memory_space<vmem>>, vector<64x1xf32>
    %cst_9 = arith.constant 9.99999974E-6 : f32
    %15 = vector.broadcast %cst_9 : f32 to vector<64x1xf32>
    %16 = arith.addf %13, %15 : vector<64x1xf32>
    %17 = math.rsqrt %16 : vector<64x1xf32>
    %18 = arith.mulf %14, %17 : vector<64x1xf32>
    %19 = vector.broadcast %18 : vector<64x1xf32> to vector<64x32xf32>
    %20 = arith.mulf %8, %19 : vector<64x32xf32>
    %c0_10 = arith.constant 0 : index
    %c0_11 = arith.constant 0 : index
    %21 = vector.load %arg4[%c0_10, %c0_11] : memref<64x1xf32, #tpu.memory_space<vmem>>, vector<64x1xf32>
    %22 = vector.broadcast %21 : vector<64x1xf32> to vector<64x32xf32>
    %23 = arith.addf %20, %22 : vector<64x32xf32>
    %cst_12 = arith.constant 0.000000e+00 : f32
    %24 = vector.broadcast %cst_12 : f32 to vector<64x32xf32>
    %25 = arith.cmpf oge, %23, %24 : vector<64x32xf32>
    %cst_13 = arith.constant 2.000000e-01 : f32
    %26 = vector.broadcast %cst_13 : f32 to vector<64x32xf32>
    %27 = arith.mulf %26, %23 : vector<64x32xf32>
    %28 = arith.select %25, %23, %27 : vector<64x32xi1>, vector<64x32xf32>
    %c0_14 = arith.constant 0 : index
    %c0_15 = arith.constant 0 : index
    %29 = vector.load %arg5[%c0_14, %c0_15] : memref<64x32xf32, #tpu.memory_space<vmem>>, vector<64x32xf32>
    tpu.vector_store %arg5[%c0_14, %c0_15], %28 {strides = array<i32>} : memref<64x32xf32, #tpu.memory_space<vmem>>, vector<64x32xf32>,
    return
  }
  func.func @transform_0(%arg0: i32) -> (i32, i32) {
    %c0_i32 = arith.constant 0 : i32
    %c0_i32_0 = arith.constant 0 : i32
    %c0_i32_1 = arith.constant 0 : i32
    return %c0_i32, %c0_i32_0 : i32, i32
  }
  func.func @transform_1(%arg0: i32) -> (i32, i32) {
    %c0_i32 = arith.constant 0 : i32
    %c0_i32_0 = arith.constant 0 : i32
    %c0_i32_1 = arith.constant 0 : i32
    return %c0_i32, %c0_i32_0 : i32, i32
  }
  func.func @transform_2(%arg0: i32) -> (i32, i32) {
    %c0_i32 = arith.constant 0 : i32
    %c0_i32_0 = arith.constant 0 : i32
    %c0_i32_1 = arith.constant 0 : i32
    return %c0_i32, %c0_i32_0 : i32, i32
  }
  func.func @transform_3(%arg0: i32) -> (i32, i32) {
    %c0_i32 = arith.constant 0 : i32
    %c0_i32_0 = arith.constant 0 : i32
    %c0_i32_1 = arith.constant 0 : i32
    return %c0_i32, %c0_i32_0 : i32, i32
  }
  func.func @transform_4(%arg0: i32) -> (i32, i32) {
    %c0_i32 = arith.constant 0 : i32
    %c0_i32_0 = arith.constant 0 : i32
    %c0_i32_1 = arith.constant 0 : i32
    return %c0_i32, %c0_i32_0 : i32, i32
  }
}

module attributes {stable_mosaic.version = 11 : i64} {
  func.func @_conv_act_kernel(%arg0: i32, %arg1: memref<1024x2xf32, #tpu.memory_space<vmem>>, %arg2: memref<1x1024xf32, #tpu.memory_space<vmem>>, %arg3: memref<1x2xf32, #tpu.memory_space<vmem>>) attributes {dimension_semantics = [#tpu.dimension_semantics<arbitrary>], iteration_bounds = array<i64: 1>, scalar_prefetch = 0 : i64, scratch_operands = 0 : i64, tpu.core_type = #tpu.core_type<tc>, window_params = [{pipeline_mode = #tpu.pipeline_mode<synchronous>, transform_indices = @transform_0, window_bounds = array<i64: 1024, 2>}, {pipeline_mode = #tpu.pipeline_mode<synchronous>, transform_indices = @transform_1, window_bounds = array<i64: 1, 1024>}, {pipeline_mode = #tpu.pipeline_mode<synchronous>, transform_indices = @transform_2, window_bounds = array<i64: 1, 2>}]} {
    %c0 = arith.constant 0 : index
    %c0_0 = arith.constant 0 : index
    %0 = vector.load %arg2[%c0, %c0_0] : memref<1x1024xf32, #tpu.memory_space<vmem>>, vector<1x1024xf32>
    %c0_1 = arith.constant 0 : index
    %c0_2 = arith.constant 0 : index
    %1 = vector.load %arg1[%c0_1, %c0_2] : memref<1024x2xf32, #tpu.memory_space<vmem>>, vector<1024x2xf32>
    %cst = arith.constant dense<0.000000e+00> : vector<1x2xf32>
    %2 = tpu.matmul %0, %1, %cst {dimension_numbers = #tpu.dot_dimension_numbers<[1], [0], [0], [1], [0, 0, 1, 1], [], []>} : vector<1x1024xf32>, vector<1024x2xf32>, vector<1x2xf32> -> vector<1x2xf32>
    %3 = arith.negf %2 : vector<1x2xf32>
    %4 = math.exp %3 : vector<1x2xf32>
    %cst_3 = arith.constant 1.000000e+00 : f32
    %5 = vector.broadcast %cst_3 : f32 to vector<1x2xf32>
    %6 = arith.addf %5, %4 : vector<1x2xf32>
    %7 = arith.divf %5, %6 : vector<1x2xf32>
    %c0_4 = arith.constant 0 : index
    %c0_5 = arith.constant 0 : index
    %8 = vector.load %arg3[%c0_4, %c0_5] : memref<1x2xf32, #tpu.memory_space<vmem>>, vector<1x2xf32>
    tpu.vector_store %arg3[%c0_4, %c0_5], %7 {strides = array<i32>} : memref<1x2xf32, #tpu.memory_space<vmem>>, vector<1x2xf32>,
    return
  }
  func.func @transform_0(%arg0: i32) -> (i32, i32) {
    %c0_i32 = arith.constant 0 : i32
    %c0_i32_0 = arith.constant 0 : i32
    %c0_i32_1 = arith.constant 0 : i32
    return %c0_i32, %c0_i32_0 : i32, i32
  }
  func.func @transform_1(%arg0: i32) -> (i32, i32) {
    %c0_i32 = arith.constant 0 : i32
    %c0_i32_0 = arith.constant 0 : i32
    %c0_i32_1 = arith.constant 0 : i32
    return %c0_i32, %c0_i32_0 : i32, i32
  }
  func.func @transform_2(%arg0: i32) -> (i32, i32) {
    %c0_i32 = arith.constant 0 : i32
    %c0_i32_0 = arith.constant 0 : i32
    %c0_i32_1 = arith.constant 0 : i32
    return %c0_i32, %c0_i32_0 : i32, i32
  }
}

</mosaic_0001>

<bundles_post_ra>
// kernel: discriminator_forward.5
= control target key start
LH: loop header
LB: loop body
LE: loop exit
PB: predicated region body
PF: predicated region fallthrough
CT: control target
= control target key end

     0   :  { %v757_v3 = vmov 0.0   ;;  %vm108_vm0 = vcmask 392192   ;;  %s1138_s0 = inlined_call_operand.vmem [shape: f32[48,2048], index: 0, kind: input, shape index: {}]   ;;  %s1139_s1 = inlined_call_operand.vmem [shape: f32[8,48], index: 1, kind: input, shape index: {}]   ;;  %s1140_s2 = inlined_call_operand.vmem [shape: f32[8,2048], index: 2, kind: output, shape index: {}]  }
   0x1   :  { %v93_v0 = vld [vmem:[%s1138_s0 + $0x288] sm:$0xff]  ;;  %v95_v1 = vld [vmem:[%s1138_s0 + $0x298] sm:$0xff]  ;;  %v92_v2 = vld [vmem:[%s1138_s0 + $0x280] sm:$0xff]  ;;  %176 = vmatprep.mubr.f32.mxu0 %v757_v3  ;;  %247 = vmatprep.mubr.f32.mxu1 %v757_v3 }
   0x2   :  { %132 = vmatprep.subr.mxu0 %v93_v0  ;;  %203 = vmatprep.subr.mxu1 %v95_v1  ;;  %v94_v4 = vld [vmem:[%s1138_s0 + $0x290] sm:$0xff]  ;;  %v77_v5 = vld [vmem:[%s1138_s0 + $0x208] sm:$0xff]  ;;  %v79_v6 = vld [vmem:[%s1138_s0 + $0x218] sm:$0xff] }
   0x3   :  { %133 = vmatpush1.msra.mxu0 %v92_v2  ;;  %204 = vmatpush1.msra.mxu1 %v94_v4  ;;  %v76_v7 = vld [vmem:[%s1138_s0 + $0x200] sm:$0xff]  ;;  %v78_v8 = vld [vmem:[%s1138_s0 + $0x210] sm:$0xff]  ;;  %v61_v9 = vld [vmem:[%s1138_s0 + $0x188] sm:$0xff] }
   0x4   :  { %134 = vmatprep.subr.mxu0 %v77_v5  ;;  %205 = vmatprep.subr.mxu1 %v79_v6  ;;  %v63_v10 = vld [vmem:[%s1138_s0 + $0x198] sm:$0xff]  ;;  %v60_v11 = vld [vmem:[%s1138_s0 + $0x180] sm:$0xff]  ;;  %v62_v12 = vld [vmem:[%s1138_s0 + $0x190] sm:$0xff] }
   0x5   :  { %135 = vmatpush1.msra.mxu0 %v76_v7  ;;  %206 = vmatpush1.msra.mxu1 %v78_v8  ;;  %v45_v13 = vld [vmem:[%s1138_s0 + $0x108] sm:$0xff]  ;;  %v47_v14 = vld [vmem:[%s1138_s0 + $0x118] sm:$0xff]  ;;  %v44_v15 = vld [vmem:[%s1138_s0 + $0x100] sm:$0xff] }
   0x6   :  { %136 = vmatprep.subr.mxu0 %v61_v9  ;;  %207 = vmatprep.subr.mxu1 %v63_v10  ;;  %v46_v16 = vld [vmem:[%s1138_s0 + $0x110] sm:$0xff]  ;;  %v29_v17 = vld [vmem:[%s1138_s0 + $0x88] sm:$0xff]  ;;  %v31_v18 = vld [vmem:[%s1138_s0 + $0x98] sm:$0xff] }
   0x7   :  { %137 = vmatpush1.msra.mxu0 %v60_v11  ;;  %208 = vmatpush1.msra.mxu1 %v62_v12  ;;  %v28_v19 = vld [vmem:[%s1138_s0 + $0x80] sm:$0xff]  ;;  %v30_v20 = vld [vmem:[%s1138_s0 + $0x90] sm:$0xff]  ;;  %v13_v21 = vld [vmem:[%s1138_s0 + $0x8] sm:$0xff] }
   0x8   :  { %138 = vmatprep.subr.mxu0 %v45_v13  ;;  %209 = vmatprep.subr.mxu1 %v47_v14  ;;  %v15_v22 = vld [vmem:[%s1138_s0 + $0x18] sm:$0xff]  ;;  %v12_v23 = vld [vmem:[%s1138_s0] sm:$0xff]  ;;  %v14_v24 = vld [vmem:[%s1138_s0 + $0x10] sm:$0xff] }
   0x9   :  { %139 = vmatpush1.msra.mxu0 %v44_v15  ;;  %210 = vmatpush1.msra.mxu1 %v46_v16  ;;  %v850_v25 = vld [vmem:[%s1139_s1] sm:$0xff]  ;;  %v97_v26 = vld [vmem:[%s1138_s0 + $0x2a8] sm:$0xff]  ;;  %v99_v27 = vld [vmem:[%s1138_s0 + $0x2b8] sm:$0xff] }
   0xa   :  { %140 = vmatprep.subr.mxu0 %v29_v17  ;;  %211 = vmatprep.subr.mxu1 %v31_v18  ;;  %v96_v28 = vld [vmem:[%s1138_s0 + $0x2a0] sm:$0xff]  ;;  %v98_v29 = vld [vmem:[%s1138_s0 + $0x2b0] sm:$0xff]  ;;  %v81_v30 = vld [vmem:[%s1138_s0 + $0x228] sm:$0xff] }
   0xb   :  { %141 = vmatpush1.msra.mxu0 %v28_v19  ;;  %212 = vmatpush1.msra.mxu1 %v30_v20  ;;  %v83_v31 = vld [vmem:[%s1138_s0 + $0x238] sm:$0xff]  ;;  %v80_v32 = vld [vmem:[%s1138_s0 + $0x220] sm:$0xff]  ;;  %v82_v33 = vld [vmem:[%s1138_s0 + $0x230] sm:$0xff] }
   0xc   :  { %142 = vmatprep.subr.mxu0 %v13_v21  ;;  %213 = vmatprep.subr.mxu1 %v15_v22  ;;  %v65_v34 = vld [vmem:[%s1138_s0 + $0x1a8] sm:$0xff]  ;;  %v67_v35 = vld [vmem:[%s1138_s0 + $0x1b8] sm:$0xff]  ;;  %v64_v36 = vld [vmem:[%s1138_s0 + $0x1a0] sm:$0xff] }
   0xd   :  { %143 = vmatpush1.msra.mxu0 %v12_v23  ;;  %214 = vmatpush1.msra.mxu1 %v14_v24  ;;  %v66_v37 = vld [vmem:[%s1138_s0 + $0x1b0] sm:$0xff]  ;;  %v49_v38 = vld [vmem:[%s1138_s0 + $0x128] sm:$0xff]  ;;  %v51_v39 = vld [vmem:[%s1138_s0 + $0x138] sm:$0xff] }
   0xe   :  { %748 = vmatmul.mubr.msk.f32.vlgmr.msra.gmra.mxu0 %vm108_vm0, %v850_v25  ;;  %749 = vmatmul.mubr.msk.f32.vlgmr.msra.gmra.mxu1 %vm108_vm0, %v850_v25  ;;  %v48_v40 = vld [vmem:[%s1138_s0 + $0x120] sm:$0xff]  ;;  %v50_v41 = vld [vmem:[%s1138_s0 + $0x130] sm:$0xff]  ;;  %v33_v42 = vld [vmem:[%s1138_s0 + $0xa8] sm:$0xff] }
   0xf   :  { %274 = vmatprep.subr.mxu0 %v97_v26  ;;  %345 = vmatprep.subr.mxu1 %v99_v27  ;;  %v35_v43 = vld [vmem:[%s1138_s0 + $0xb8] sm:$0xff]  ;;  %v32_v44 = vld [vmem:[%s1138_s0 + $0xa0] sm:$0xff]  ;;  %v34_v45 = vld [vmem:[%s1138_s0 + $0xb0] sm:$0xff] }
  0x10   :  { %275 = vmatpush1.msra.mxu0 %v96_v28  ;;  %346 = vmatpush1.msra.mxu1 %v98_v29  ;;  %v17_v46 = vld [vmem:[%s1138_s0 + $0x28] sm:$0xff]  ;;  %v19_v47 = vld [vmem:[%s1138_s0 + $0x38] sm:$0xff]  ;;  %v16_v48 = vld [vmem:[%s1138_s0 + $0x20] sm:$0xff] }
  0x11   :  { %276 = vmatprep.subr.mxu0 %v81_v30  ;;  %347 = vmatprep.subr.mxu1 %v83_v31  ;;  %v18_v49 = vld [vmem:[%s1138_s0 + $0x30] sm:$0xff]  ;;  %v101_v50 = vld [vmem:[%s1138_s0 + $0x2c8] sm:$0xff]  ;;  %v103_v51 = vld [vmem:[%s1138_s0 + $0x2d8] sm:$0xff] }
  0x12   :  { %277 = vmatpush1.msra.mxu0 %v80_v32  ;;  %348 = vmatpush1.msra.mxu1 %v82_v33  ;;  %v100_v52 = vld [vmem:[%s1138_s0 + $0x2c0] sm:$0xff]  ;;  %v102_v53 = vld [vmem:[%s1138_s0 + $0x2d0] sm:$0xff]  ;;  %v85_v54 = vld [vmem:[%s1138_s0 + $0x248] sm:$0xff] }
  0x13   :  { %278 = vmatprep.subr.mxu0 %v65_v34  ;;  %349 = vmatprep.subr.mxu1 %v67_v35  ;;  %v87_v55 = vld [vmem:[%s1138_s0 + $0x258] sm:$0xff]  ;;  %v84_v56 = vld [vmem:[%s1138_s0 + $0x240] sm:$0xff]  ;;  %v86_v57 = vld [vmem:[%s1138_s0 + $0x250] sm:$0xff] }
  0x14   :  { %279 = vmatpush1.msra.mxu0 %v64_v36  ;;  %350 = vmatpush1.msra.mxu1 %v66_v37  ;;  %v69_v58 = vld [vmem:[%s1138_s0 + $0x1c8] sm:$0xff]  ;;  %v71_v59 = vld [vmem:[%s1138_s0 + $0x1d8] sm:$0xff]  ;;  %v68_v60 = vld [vmem:[%s1138_s0 + $0x1c0] sm:$0xff] }
  0x15   :  { %280 = vmatprep.subr.mxu0 %v49_v38  ;;  %351 = vmatprep.subr.mxu1 %v51_v39  ;;  %v70_v61 = vld [vmem:[%s1138_s0 + $0x1d0] sm:$0xff]  ;;  %v53_v62 = vld [vmem:[%s1138_s0 + $0x148] sm:$0xff]  ;;  %v55_v63 = vld [vmem:[%s1138_s0 + $0x158] sm:$0xff] }
  0x16   :  { %281 = vmatpush1.msra.mxu0 %v48_v40  ;;  %352 = vmatpush1.msra.mxu1 %v50_v41  ;;  %v52_v0 = vld [vmem:[%s1138_s0 + $0x140] sm:$0xff]  ;;  %v54_v1 = vld [vmem:[%s1138_s0 + $0x150] sm:$0xff]  ;;  %v37_v2 = vld [vmem:[%s1138_s0 + $0xc8] sm:$0xff] }
  0x17   :  { %282 = vmatprep.subr.mxu0 %v33_v42  ;;  %353 = vmatprep.subr.mxu1 %v35_v43  ;;  %v39_v4 = vld [vmem:[%s1138_s0 + $0xd8] sm:$0xff]  ;;  %v36_v5 = vld [vmem:[%s1138_s0 + $0xc0] sm:$0xff]  ;;  %v38_v6 = vld [vmem:[%s1138_s0 + $0xd0] sm:$0xff] }
  0x18   :  { %283 = vmatpush1.msra.mxu0 %v32_v44  ;;  %354 = vmatpush1.msra.mxu1 %v34_v45  ;;  %v21_v7 = vld [vmem:[%s1138_s0 + $0x48] sm:$0xff]  ;;  %v23_v8 = vld [vmem:[%s1138_s0 + $0x58] sm:$0xff]  ;;  %v20_v9 = vld [vmem:[%s1138_s0 + $0x40] sm:$0xff] }
  0x19   :  { %284 = vmatprep.subr.mxu0 %v17_v46  ;;  %355 = vmatprep.subr.mxu1 %v19_v47  ;;  %v22_v10 = vld [vmem:[%s1138_s0 + $0x50] sm:$0xff]  ;;  %v105_v11 = vld [vmem:[%s1138_s0 + $0x2e8] sm:$0xff]  ;;  %v107_v12 = vld [vmem:[%s1138_s0 + $0x2f8] sm:$0xff] }
  0x1a   :  { %285 = vmatpush1.msra.mxu0 %v16_v48  ;;  %318 = vmatprep.mubr.f32.mxu0 %v757_v3  ;;  %v104_v13 = vld [vmem:[%s1138_s0 + $0x2e0] sm:$0xff]  ;;  %v106_v14 = vld [vmem:[%s1138_s0 + $0x2f0] sm:$0xff]  ;;  %v89_v15 = vld [vmem:[%s1138_s0 + $0x268] sm:$0xff] }
  0x1b   :  { %356 = vmatpush1.msra.mxu1 %v18_v49  ;;  %389 = vmatprep.mubr.f32.mxu1 %v757_v3  ;;  %v91_v16 = vld [vmem:[%s1138_s0 + $0x278] sm:$0xff]  ;;  %v88_v17 = vld [vmem:[%s1138_s0 + $0x260] sm:$0xff]  ;;  %v90_v18 = vld [vmem:[%s1138_s0 + $0x270] sm:$0xff] }
  0x1c   :  { %750 = vmatmul.mubr.msk.f32.vlgmr.msra.gmra.mxu0 %vm108_vm0, %v850_v25  ;;  %751 = vmatmul.mubr.msk.f32.vlgmr.msra.gmra.mxu1 %vm108_vm0, %v850_v25  ;;  %v73_v19 = vld [vmem:[%s1138_s0 + $0x1e8] sm:$0xff]  ;;  %v75_v20 = vld [vmem:[%s1138_s0 + $0x1f8] sm:$0xff]  ;;  %v72_v21 = vld [vmem:[%s1138_s0 + $0x1e0] sm:$0xff] }
  0x1d   :  { %416 = vmatprep.subr.mxu0 %v101_v50  ;;  %487 = vmatprep.subr.mxu1 %v103_v51  ;;  %v74_v22 = vld [vmem:[%s1138_s0 + $0x1f0] sm:$0xff]  ;;  %v57_v23 = vld [vmem:[%s1138_s0 + $0x168] sm:$0xff]  ;;  %v59_v24 = vld [vmem:[%s1138_s0 + $0x178] sm:$0xff] }
  0x1e   :  { %417 = vmatpush1.msra.mxu0 %v100_v52  ;;  %488 = vmatpush1.msra.mxu1 %v102_v53  ;;  %v56_v26 = vld [vmem:[%s1138_s0 + $0x160] sm:$0xff]  ;;  %v58_v27 = vld [vmem:[%s1138_s0 + $0x170] sm:$0xff]  ;;  %v41_v28 = vld [vmem:[%s1138_s0 + $0xe8] sm:$0xff] }
  0x1f   :  { %418 = vmatprep.subr.mxu0 %v85_v54  ;;  %489 = vmatprep.subr.mxu1 %v87_v55  ;;  %v43_v29 = vld [vmem:[%s1138_s0 + $0xf8] sm:$0xff]  ;;  %v40_v30 = vld [vmem:[%s1138_s0 + $0xe0] sm:$0xff]  ;;  %v42_v31 = vld [vmem:[%s1138_s0 + $0xf0] sm:$0xff] }
  0x20   :  { %419 = vmatpush1.msra.mxu0 %v84_v56  ;;  %490 = vmatpush1.msra.mxu1 %v86_v57  ;;  %v25_v32 = vld [vmem:[%s1138_s0 + $0x68] sm:$0xff]  ;;  %v27_v33 = vld [vmem:[%s1138_s0 + $0x78] sm:$0xff]  ;;  %v24_v34 = vld [vmem:[%s1138_s0 + $0x60] sm:$0xff] }
  0x21   :  { %420 = vmatprep.subr.mxu0 %v69_v58  ;;  %491 = vmatprep.subr.mxu1 %v71_v59  ;;  %v26_v35 = vld [vmem:[%s1138_s0 + $0x70] sm:$0xff] }
  0x22   :  { %421 = vmatpush1.msra.mxu0 %v68_v60  ;;  %492 = vmatpush1.msra.mxu1 %v70_v61 }
  0x23   :  { %422 = vmatprep.subr.mxu0 %v53_v62  ;;  %493 = vmatprep.subr.mxu1 %v55_v63 }
  0x24   :  { %423 = vmatpush1.msra.mxu0 %v52_v0  ;;  %494 = vmatpush1.msra.mxu1 %v54_v1 }
  0x25   :  { %424 = vmatprep.subr.mxu0 %v37_v2  ;;  %495 = vmatprep.subr.mxu1 %v39_v4 }
  0x26   :  { %425 = vmatpush1.msra.mxu0 %v36_v5  ;;  %496 = vmatpush1.msra.mxu1 %v38_v6 }
  0x27   :  { %426 = vmatprep.subr.mxu0 %v21_v7  ;;  %497 = vmatprep.subr.mxu1 %v23_v8 }
  0x28   :  { %427 = vmatpush1.msra.mxu0 %v20_v9  ;;  %460 = vmatprep.mubr.f32.mxu0 %v757_v3 }
  0x29   :  { %498 = vmatpush1.msra.mxu1 %v22_v10  ;;  %531 = vmatprep.mubr.f32.mxu1 %v757_v3 }
  0x2a   :  { %752 = vmatmul.mubr.msk.f32.vlgmr.msra.gmra.mxu0 %vm108_vm0, %v850_v25  ;;  %753 = vmatmul.mubr.msk.f32.vlgmr.msra.gmra.mxu1 %vm108_vm0, %v850_v25 }
  0x2b   :  { %558 = vmatprep.subr.mxu0 %v105_v11  ;;  %629 = vmatprep.subr.mxu1 %v107_v12 }
  0x2c   :  { %559 = vmatpush1.msra.mxu0 %v104_v13  ;;  %630 = vmatpush1.msra.mxu1 %v106_v14 }
  0x2d   :  { %560 = vmatprep.subr.mxu0 %v89_v15  ;;  %631 = vmatprep.subr.mxu1 %v91_v16 }
  0x2e   :  { %561 = vmatpush1.msra.mxu0 %v88_v17  ;;  %632 = vmatpush1.msra.mxu1 %v90_v18 }
  0x2f   :  { %562 = vmatprep.subr.mxu0 %v73_v19  ;;  %633 = vmatprep.subr.mxu1 %v75_v20 }
  0x30   :  { %563 = vmatpush1.msra.mxu0 %v72_v21  ;;  %634 = vmatpush1.msra.mxu1 %v74_v22 }
  0x31   :  { %564 = vmatprep.subr.mxu0 %v57_v23  ;;  %635 = vmatprep.subr.mxu1 %v59_v24 }
  0x32   :  { %565 = vmatpush1.msra.mxu0 %v56_v26  ;;  %636 = vmatpush1.msra.mxu1 %v58_v27 }
  0x33   :  { %566 = vmatprep.subr.mxu0 %v41_v28  ;;  %637 = vmatprep.subr.mxu1 %v43_v29 }
  0x34   :  { %567 = vmatpush1.msra.mxu0 %v40_v30  ;;  %638 = vmatpush1.msra.mxu1 %v42_v31 }
  0x35   :  { %568 = vmatprep.subr.mxu0 %v25_v32  ;;  %639 = vmatprep.subr.mxu1 %v27_v33 }
  0x36   :  { %569 = vmatpush1.msra.mxu0 %v24_v34  ;;  %602 = vmatprep.mubr.f32.mxu0 %v757_v3 }
  0x37   :  { %640 = vmatpush1.msra.mxu1 %v26_v35  ;;  %673 = vmatprep.mubr.f32.mxu1 %v757_v3 }
  0x38   :  { %754 = vmatmul.mubr.msk.f32.vlgmr.msra.gmra.mxu0 %vm108_vm0, %v850_v25  ;;  %755 = vmatmul.mubr.msk.f32.vlgmr.msra.gmra.mxu1 %vm108_vm0, %v850_v25 }
  0xce   :  { %v178_v36 = vpop.f32.mrf.mxu0  ;;  %v249_v37 = vpop.f32.mrf.mxu1 }
  0xcf   :  { %vm680_vm1 = vcmp.ge.f32.partialorder %v178_v36, 0.0  ;;  %v696_v38 = vmul.f32 0.2, %v178_v36  ;;  %vm682_vm2 = vcmp.ge.f32.partialorder %v249_v37, 0.0  ;;  %v698_v39 = vmul.f32 0.2, %v249_v37 }
  0xd0   :  { %v180_v40 = vpop.f32.mrf.mxu0  ;;  %v251_v41 = vpop.f32.mrf.mxu1 }
  0xd1   :  { %v712_v42 = vsel %vm680_vm1, %v178_v36, %v696_v38  ;;  %v714_v43 = vsel %vm682_vm2, %v249_v37, %v698_v39  ;;  %vm681_vm3 = vcmp.ge.f32.partialorder %v180_v40, 0.0  ;;  %v697_v44 = vmul.f32 0.2, %v180_v40 }
  0xd2   :  { %728 = vst [vmem:[%s1140_s2] sm:$0xff] %v712_v42  ;;  %730 = vst [vmem:[%s1140_s2 + $0x10] sm:$0xff] %v714_v43  ;;  %vm683_vm4 = vcmp.ge.f32.partialorder %v251_v41, 0.0  ;;  %v699_v3 = vmul.f32 0.2, %v251_v41 }
  0xd3   :  { %v713_v25 = vsel %vm681_vm3, %v180_v40, %v697_v44 }
  0xd4   :  { %729 = vst [vmem:[%s1140_s2 + $0x8] sm:$0xff] %v713_v25  ;;  %v715_v45 = vsel %vm683_vm4, %v251_v41, %v699_v3 }
  0xd5   :  { %731 = vst [vmem:[%s1140_s2 + $0x18] sm:$0xff] %v715_v45 }
  0xdc   :  { %v320_v46 = vpop.f32.mrf.mxu0  ;;  %v391_v47 = vpop.f32.mrf.mxu1 }
  0xdd   :  { %vm684_vm5 = vcmp.ge.f32.partialorder %v320_v46, 0.0  ;;  %v700_v48 = vmul.f32 0.2, %v320_v46  ;;  %vm686_vm6 = vcmp.ge.f32.partialorder %v391_v47, 0.0  ;;  %v702_v49 = vmul.f32 0.2, %v391_v47 }
  0xde   :  { %v322_v50 = vpop.f32.mrf.mxu0  ;;  %v393_v51 = vpop.f32.mrf.mxu1 }
  0xdf   :  { %v716_v52 = vsel %vm684_vm5, %v320_v46, %v700_v48  ;;  %v718_v53 = vsel %vm686_vm6, %v391_v47, %v702_v49  ;;  %vm685_vm7 = vcmp.ge.f32.partialorder %v322_v50, 0.0  ;;  %v701_v54 = vmul.f32 0.2, %v322_v50 }
  0xe0   :  { %732 = vst [vmem:[%s1140_s2 + $0x20] sm:$0xff] %v716_v52  ;;  %734 = vst [vmem:[%s1140_s2 + $0x30] sm:$0xff] %v718_v53  ;;  %vm687_vm8 = vcmp.ge.f32.partialorder %v393_v51, 0.0  ;;  %v703_v55 = vmul.f32 0.2, %v393_v51 }
  0xe1   :  { %v717_v56 = vsel %vm685_vm7, %v322_v50, %v701_v54 }
  0xe2   :  { %733 = vst [vmem:[%s1140_s2 + $0x28] sm:$0xff] %v717_v56  ;;  %v719_v57 = vsel %vm687_vm8, %v393_v51, %v703_v55 }
  0xe3   :  { %735 = vst [vmem:[%s1140_s2 + $0x38] sm:$0xff] %v719_v57 }
  0xea   :  { %v462_v58 = vpop.f32.mrf.mxu0  ;;  %v533_v59 = vpop.f32.mrf.mxu1 }
  0xeb   :  { %vm688_vm9 = vcmp.ge.f32.partialorder %v462_v58, 0.0  ;;  %v704_v60 = vmul.f32 0.2, %v462_v58  ;;  %vm690_vm10 = vcmp.ge.f32.partialorder %v533_v59, 0.0  ;;  %v706_v61 = vmul.f32 0.2, %v533_v59 }
  0xec   :  { %v464_v62 = vpop.f32.mrf.mxu0  ;;  %v535_v63 = vpop.f32.mrf.mxu1 }
  0xed   :  { %v720_v0 = vsel %vm688_vm9, %v462_v58, %v704_v60  ;;  %v722_v1 = vsel %vm690_vm10, %v533_v59, %v706_v61  ;;  %vm689_vm11 = vcmp.ge.f32.partialorder %v464_v62, 0.0  ;;  %v705_v2 = vmul.f32 0.2, %v464_v62 }
  0xee   :  { %736 = vst [vmem:[%s1140_s2 + $0x40] sm:$0xff] %v720_v0  ;;  %738 = vst [vmem:[%s1140_s2 + $0x50] sm:$0xff] %v722_v1  ;;  %vm691_vm12 = vcmp.ge.f32.partialorder %v535_v63, 0.0  ;;  %v707_v4 = vmul.f32 0.2, %v535_v63 }
  0xef   :  { %v721_v5 = vsel %vm689_vm11, %v464_v62, %v705_v2 }
  0xf0   :  { %737 = vst [vmem:[%s1140_s2 + $0x48] sm:$0xff] %v721_v5  ;;  %v723_v6 = vsel %vm691_vm12, %v535_v63, %v707_v4 }
  0xf1   :  { %739 = vst [vmem:[%s1140_s2 + $0x58] sm:$0xff] %v723_v6 }
  0xf8   :  { %v604_v7 = vpop.f32.mrf.mxu0  ;;  %v675_v8 = vpop.f32.mrf.mxu1 }
  0xf9   :  { %vm692_vm13 = vcmp.ge.f32.partialorder %v604_v7, 0.0  ;;  %v708_v9 = vmul.f32 0.2, %v604_v7  ;;  %vm694_vm14 = vcmp.ge.f32.partialorder %v675_v8, 0.0  ;;  %v710_v10 = vmul.f32 0.2, %v675_v8 }
  0xfa   :  { %v606_v11 = vpop.f32.mrf.mxu0  ;;  %v677_v12 = vpop.f32.mrf.mxu1 }
  0xfb   :  { %v724_v13 = vsel %vm692_vm13, %v604_v7, %v708_v9  ;;  %v726_v14 = vsel %vm694_vm14, %v675_v8, %v710_v10  ;;  %vm693_vm15 = vcmp.ge.f32.partialorder %v606_v11, 0.0  ;;  %v709_v15 = vmul.f32 0.2, %v606_v11 }
  0xfc   :  { %740 = vst [vmem:[%s1140_s2 + $0x60] sm:$0xff] %v724_v13  ;;  %742 = vst [vmem:[%s1140_s2 + $0x70] sm:$0xff] %v726_v14  ;;  %vm695_vm0 = vcmp.ge.f32.partialorder %v677_v12, 0.0  ;;  %v711_v16 = vmul.f32 0.2, %v677_v12 }
  0xfd   :  { %v725_v17 = vsel %vm693_vm15, %v606_v11, %v709_v15 }
  0xfe   :  { %741 = vst [vmem:[%s1140_s2 + $0x68] sm:$0xff] %v725_v17  ;;  %v727_v18 = vsel %vm695_vm0, %v677_v12, %v711_v16 }
  0xff   :  { %743 = vst [vmem:[%s1140_s2 + $0x78] sm:$0xff] %v727_v18 }

// kernel: discriminator_forward.6
= control target key start
LH: loop header
LB: loop body
LE: loop exit
PB: predicated region body
PF: predicated region fallthrough
CT: control target
= control target key end

     0   :  { %v367_v3 = vmov 0.0   ;;  %s637_s0 = inlined_call_operand.vmem [shape: f32[128,512], index: 0, kind: input, shape index: {}]   ;;  %s638_s1 = inlined_call_operand.vmem [shape: f32[16,128], index: 1, kind: input, shape index: {}]   ;;  %s639_s3 = inlined_call_operand.vmem [shape: f32[16,1], index: 3, kind: input, shape index: {}]   ;;  %s640_s2 = inlined_call_operand.vmem [shape: f32[16,1], index: 2, kind: input, shape index: {}]   ;;  %s641_s4 = inlined_call_operand.vmem [shape: f32[16,512], index: 4, kind: output, shape index: {}]  }
   0x1   :  { %v80_v0 = vld [vmem:[%s637_s0 + $0x1e8] sm:$0xff]  ;;  %v79_v1 = vld [vmem:[%s637_s0 + $0x1e0] sm:$0xff]  ;;  %147 = vmatprep.mubr.f32.mxu0 %v367_v3  ;;  %224 = vmatprep.mubr.f32.mxu1 %v367_v3  ;;  %v82_v4 = vld [vmem:[%s637_s0 + $0x1f8] sm:$0xff] }
   0x2   :  { %v76_v2 = vld [vmem:[%s637_s0 + $0x1c8] sm:$0xff]  ;;  %83 = vmatprep.subr.mxu0 %v80_v0  ;;  %v75_v5 = vld [vmem:[%s637_s0 + $0x1c0] sm:$0xff]  ;;  %v81_v6 = vld [vmem:[%s637_s0 + $0x1f0] sm:$0xff]  ;;  %160 = vmatprep.subr.mxu1 %v82_v4 }
   0x3   :  { %84 = vmatpush1.msra.mxu0 %v79_v1  ;;  %v72_v7 = vld [vmem:[%s637_s0 + $0x1a8] sm:$0xff]  ;;  %v78_v8 = vld [vmem:[%s637_s0 + $0x1d8] sm:$0xff]  ;;  %161 = vmatpush1.msra.mxu1 %v81_v6  ;;  %v71_v9 = vld [vmem:[%s637_s0 + $0x1a0] sm:$0xff] }
   0x4   :  { %85 = vmatprep.subr.mxu0 %v76_v2  ;;  %v77_v10 = vld [vmem:[%s637_s0 + $0x1d0] sm:$0xff]  ;;  %v74_v11 = vld [vmem:[%s637_s0 + $0x1b8] sm:$0xff]  ;;  %162 = vmatprep.subr.mxu1 %v78_v8  ;;  %v68_v12 = vld [vmem:[%s637_s0 + $0x188] sm:$0xff] }
   0x5   :  { %86 = vmatpush1.msra.mxu0 %v75_v5  ;;  %v73_v13 = vld [vmem:[%s637_s0 + $0x1b0] sm:$0xff]  ;;  %163 = vmatpush1.msra.mxu1 %v77_v10  ;;  %v67_v14 = vld [vmem:[%s637_s0 + $0x180] sm:$0xff]  ;;  %v70_v15 = vld [vmem:[%s637_s0 + $0x198] sm:$0xff] }
   0x6   :  { %87 = vmatprep.subr.mxu0 %v72_v7  ;;  %164 = vmatprep.subr.mxu1 %v74_v11  ;;  %v64_v16 = vld [vmem:[%s637_s0 + $0x168] sm:$0xff]  ;;  %v69_v17 = vld [vmem:[%s637_s0 + $0x190] sm:$0xff]  ;;  %v63_v18 = vld [vmem:[%s637_s0 + $0x160] sm:$0xff] }
   0x7   :  { %88 = vmatpush1.msra.mxu0 %v71_v9  ;;  %165 = vmatpush1.msra.mxu1 %v73_v13  ;;  %v66_v19 = vld [vmem:[%s637_s0 + $0x178] sm:$0xff]  ;;  %v60_v20 = vld [vmem:[%s637_s0 + $0x148] sm:$0xff]  ;;  %v65_v21 = vld [vmem:[%s637_s0 + $0x170] sm:$0xff] }
   0x8   :  { %89 = vmatprep.subr.mxu0 %v68_v12  ;;  %166 = vmatprep.subr.mxu1 %v70_v15  ;;  %v59_v22 = vld [vmem:[%s637_s0 + $0x140] sm:$0xff]  ;;  %v62_v23 = vld [vmem:[%s637_s0 + $0x158] sm:$0xff]  ;;  %v56_v24 = vld [vmem:[%s637_s0 + $0x128] sm:$0xff] }
   0x9   :  { %90 = vmatpush1.msra.mxu0 %v67_v14  ;;  %167 = vmatpush1.msra.mxu1 %v69_v17  ;;  %v61_v25 = vld [vmem:[%s637_s0 + $0x150] sm:$0xff]  ;;  %v55_v26 = vld [vmem:[%s637_s0 + $0x120] sm:$0xff]  ;;  %v58_v27 = vld [vmem:[%s637_s0 + $0x138] sm:$0xff] }
   0xa   :  { %91 = vmatprep.subr.mxu0 %v64_v16  ;;  %168 = vmatprep.subr.mxu1 %v66_v19  ;;  %v52_v28 = vld [vmem:[%s637_s0 + $0x108] sm:$0xff]  ;;  %v57_v29 = vld [vmem:[%s637_s0 + $0x130] sm:$0xff]  ;;  %v51_v30 = vld [vmem:[%s637_s0 + $0x100] sm:$0xff] }
   0xb   :  { %92 = vmatpush1.msra.mxu0 %v63_v18  ;;  %169 = vmatpush1.msra.mxu1 %v65_v21  ;;  %v54_v31 = vld [vmem:[%s637_s0 + $0x118] sm:$0xff]  ;;  %v48_v32 = vld [vmem:[%s637_s0 + $0xe8] sm:$0xff]  ;;  %v53_v33 = vld [vmem:[%s637_s0 + $0x110] sm:$0xff] }
   0xc   :  { %93 = vmatprep.subr.mxu0 %v60_v20  ;;  %170 = vmatprep.subr.mxu1 %v62_v23  ;;  %v47_v34 = vld [vmem:[%s637_s0 + $0xe0] sm:$0xff]  ;;  %v50_v35 = vld [vmem:[%s637_s0 + $0xf8] sm:$0xff]  ;;  %v44_v36 = vld [vmem:[%s637_s0 + $0xc8] sm:$0xff] }
   0xd   :  { %94 = vmatpush1.msra.mxu0 %v59_v22  ;;  %171 = vmatpush1.msra.mxu1 %v61_v25  ;;  %v49_v37 = vld [vmem:[%s637_s0 + $0xf0] sm:$0xff]  ;;  %v43_v38 = vld [vmem:[%s637_s0 + $0xc0] sm:$0xff]  ;;  %v46_v39 = vld [vmem:[%s637_s0 + $0xd8] sm:$0xff] }
   0xe   :  { %95 = vmatprep.subr.mxu0 %v56_v24  ;;  %172 = vmatprep.subr.mxu1 %v58_v27  ;;  %v40_v40 = vld [vmem:[%s637_s0 + $0xa8] sm:$0xff]  ;;  %v45_v41 = vld [vmem:[%s637_s0 + $0xd0] sm:$0xff]  ;;  %v39_v42 = vld [vmem:[%s637_s0 + $0xa0] sm:$0xff] }
   0xf   :  { %96 = vmatpush1.msra.mxu0 %v55_v26  ;;  %173 = vmatpush1.msra.mxu1 %v57_v29  ;;  %v42_v43 = vld [vmem:[%s637_s0 + $0xb8] sm:$0xff]  ;;  %v36_v44 = vld [vmem:[%s637_s0 + $0x88] sm:$0xff]  ;;  %v41_v45 = vld [vmem:[%s637_s0 + $0xb0] sm:$0xff] }
  0x10   :  { %97 = vmatprep.subr.mxu0 %v52_v28  ;;  %174 = vmatprep.subr.mxu1 %v54_v31  ;;  %v35_v46 = vld [vmem:[%s637_s0 + $0x80] sm:$0xff]  ;;  %v38_v47 = vld [vmem:[%s637_s0 + $0x98] sm:$0xff]  ;;  %v32_v48 = vld [vmem:[%s637_s0 + $0x68] sm:$0xff] }
  0x11   :  { %98 = vmatpush1.msra.mxu0 %v51_v30  ;;  %175 = vmatpush1.msra.mxu1 %v53_v33  ;;  %v37_v49 = vld [vmem:[%s637_s0 + $0x90] sm:$0xff]  ;;  %v31_v50 = vld [vmem:[%s637_s0 + $0x60] sm:$0xff]  ;;  %v34_v51 = vld [vmem:[%s637_s0 + $0x78] sm:$0xff] }
  0x12   :  { %99 = vmatprep.subr.mxu0 %v48_v32  ;;  %176 = vmatprep.subr.mxu1 %v50_v35  ;;  %v28_v52 = vld [vmem:[%s637_s0 + $0x48] sm:$0xff]  ;;  %v33_v53 = vld [vmem:[%s637_s0 + $0x70] sm:$0xff]  ;;  %v27_v54 = vld [vmem:[%s637_s0 + $0x40] sm:$0xff] }
  0x13   :  { %100 = vmatpush1.msra.mxu0 %v47_v34  ;;  %177 = vmatpush1.msra.mxu1 %v49_v37  ;;  %v30_v55 = vld [vmem:[%s637_s0 + $0x58] sm:$0xff]  ;;  %v24_v56 = vld [vmem:[%s637_s0 + $0x28] sm:$0xff]  ;;  %v29_v57 = vld [vmem:[%s637_s0 + $0x50] sm:$0xff] }
  0x14   :  { %101 = vmatprep.subr.mxu0 %v44_v36  ;;  %178 = vmatprep.subr.mxu1 %v46_v39  ;;  %v23_v58 = vld [vmem:[%s637_s0 + $0x20] sm:$0xff]  ;;  %v26_v59 = vld [vmem:[%s637_s0 + $0x38] sm:$0xff]  ;;  %v20_v60 = vld [vmem:[%s637_s0 + $0x8] sm:$0xff] }
  0x15   :  { %102 = vmatpush1.msra.mxu0 %v43_v38  ;;  %179 = vmatpush1.msra.mxu1 %v45_v41  ;;  %v25_v61 = vld [vmem:[%s637_s0 + $0x30] sm:$0xff]  ;;  %v19_v62 = vld [vmem:[%s637_s0] sm:$0xff]  ;;  %v22_v63 = vld [vmem:[%s637_s0 + $0x18] sm:$0xff] }
  0x16   :  { %103 = vmatprep.subr.mxu0 %v40_v40  ;;  %180 = vmatprep.subr.mxu1 %v42_v43  ;;  %v17_v0 = vld [vmem:[%s638_s1] sm:$0xff]  ;;  %v21_v1 = vld [vmem:[%s637_s0 + $0x10] sm:$0xff]  ;;  %v18_v2 = vld [vmem:[%s638_s1 + $0x8] sm:$0xff]  ;;  %v368_v43 = vmov 0  }
  0x17   :  { %104 = vmatpush1.msra.mxu0 %v39_v42  ;;  %181 = vmatpush1.msra.mxu1 %v41_v45 }
  0x18   :  { %105 = vmatprep.subr.mxu0 %v36_v44  ;;  %182 = vmatprep.subr.mxu1 %v38_v47  ;;  %v303_v44 = vld [vmem:[%s639_s3] sm:$0xff] }
  0x19   :  { %106 = vmatpush1.msra.mxu0 %v35_v46  ;;  %183 = vmatpush1.msra.mxu1 %v37_v49 }
  0x1a   :  { %107 = vmatprep.subr.mxu0 %v32_v48  ;;  %184 = vmatprep.subr.mxu1 %v34_v51  ;;  %v277_v51 = vld [vmem:[%s640_s2] sm:$0xff] }
  0x1b   :  { %108 = vmatpush1.msra.mxu0 %v31_v50  ;;  %185 = vmatpush1.msra.mxu1 %v33_v53 }
  0x1c   :  { %109 = vmatprep.subr.mxu0 %v28_v52  ;;  %186 = vmatprep.subr.mxu1 %v30_v55 }
  0x1d   :  { %110 = vmatpush1.msra.mxu0 %v27_v54  ;;  %187 = vmatpush1.msra.mxu1 %v29_v57  ;;  %v278_v54 = vld [vmem:[%s640_s2 + $0x8] sm:$0xff] }
  0x1e   :  { %111 = vmatprep.subr.mxu0 %v24_v56  ;;  %188 = vmatprep.subr.mxu1 %v26_v59  ;;  %v304_v57 = vld [vmem:[%s639_s3 + $0x8] sm:$0xff] }
  0x1f   :  { %112 = vmatpush1.msra.mxu0 %v23_v58  ;;  %189 = vmatpush1.msra.mxu1 %v25_v61 }
  0x20   :  { %113 = vmatprep.subr.mxu0 %v20_v60  ;;  %190 = vmatprep.subr.mxu1 %v22_v63 }
  0x21   :  { %114 = vmatpush1.msra.mxu0 %v19_v62  ;;  %191 = vmatpush1.msra.mxu1 %v21_v1 }
  0x22   :  { %148 = vmatmul.mubr.f32.vlgmr.msra.gmra.mxu0 %v17_v0  ;;  %225 = vmatmul.mubr.f32.vlgmr.msra.gmra.mxu1 %v17_v0 }
  0x23   :  { %153 = vmatprep.mubr.f32.mxu0 %v367_v3  ;;  %230 = vmatprep.mubr.f32.mxu1 %v367_v3 }
  0x24   :  { %362 = vset.pattern.permute.xlu1 %v368_v43  ;;  %361 = vset.pattern.permute.xlu0 %v368_v43 }
  0x26   :  { %154 = vmatmul.mubr.f32.gmra.mxu0 %v18_v2  ;;  %231 = vmatmul.mubr.f32.gmra.mxu1 %v18_v2 }
  0xe2   :  { %v149_v4 = vpop.f32.mrf.mxu0  ;;  %v226_v5 = vpop.f32.mrf.mxu1 }
  0xe4   :  { %v151_v6 = vpop.f32.mrf.mxu0  ;;  %v228_v8 = vpop.f32.mrf.mxu1 }
  0xe5   :  { %v237_v7 = vadd.f32 %v151_v6, %v149_v4 }
  0xe6   :  { %v155_v9 = vpop.f32.mrf.mxu0  ;;  %v232_v12 = vpop.f32.mrf.mxu1 }
  0xe7   :  { %v238_v10 = vadd.f32 %v237_v7, %v226_v5 }
  0xe8   :  { %v157_v11 = vpop.f32.mrf.mxu0  ;;  %v234_v16 = vpop.f32.mrf.mxu1 }
  0xe9   :  { %v242_v13 = vadd.f32 %v157_v11, %v155_v9  ;;  %v239_v14 = vadd.f32 %v238_v10, %v228_v8 }
  0xeb   :  { %v243_v15 = vadd.f32 %v242_v13, %v232_v12  ;;  %240 = vadd.xlane.f32.xlu0 %v239_v14 }
  0xed   :  { %v244_v17 = vadd.f32 %v243_v15, %v234_v16 }
  0xef   :  { %245 = vadd.xlane.f32.xlu0 %v244_v17 }
 0x174   :  { %v241_v18 = vpop.xlane.xlu0 %240 }
 0x175   :  { %v247_v3 = vmul.f32 0.001953125, %v241_v18 }
 0x177   :  { %v249_v19 = vsub.f32 %v149_v4, %v247_v3  ;;  %v250_v20 = vsub.f32 %v151_v6, %v247_v3  ;;  %v251_v21 = vsub.f32 %v226_v5, %v247_v3  ;;  %v252_v23 = vsub.f32 %v228_v8, %v247_v3 }
 0x178   :  { %v246_v22 = vpop.xlane.xlu0 %245 }
 0x179   :  { %v248_v24 = vmul.f32 0.001953125, %v246_v22  ;;  %v257_v25 = vmul.f32 %v249_v19, %v249_v19  ;;  %v258_v26 = vmul.f32 %v250_v20, %v250_v20  ;;  %v259_v27 = vmul.f32 %v251_v21, %v251_v21 }
 0x17a   :  { %v260_v32 = vmul.f32 %v252_v23, %v252_v23 }
 0x17b   :  { %v253_v28 = vsub.f32 %v155_v9, %v248_v24  ;;  %v254_v29 = vsub.f32 %v157_v11, %v248_v24  ;;  %v265_v30 = vadd.f32 %v258_v26, %v257_v25  ;;  %v255_v31 = vsub.f32 %v232_v12, %v248_v24 }
 0x17c   :  { %v596_v34 = vsub.f32 %v234_v16, %v248_v24 }
 0x17d   :  { %v266_v33 = vadd.f32 %v265_v30, %v259_v27  ;;  %v261_v35 = vmul.f32 %v253_v28, %v253_v28  ;;  %v262_v36 = vmul.f32 %v254_v29, %v254_v29  ;;  %v263_v38 = vmul.f32 %v255_v31, %v255_v31 }
 0x17e   :  { %v264_v40 = vmul.f32 %v596_v34, %v596_v34 }
 0x17f   :  { %v267_v37 = vadd.f32 %v266_v33, %v260_v32  ;;  %v270_v39 = vadd.f32 %v262_v36, %v261_v35 }
 0x181   :  { %268 = vadd.xlane.f32.xlu1 %v267_v37  ;;  %v271_v41 = vadd.f32 %v270_v39, %v263_v38 }
 0x183   :  { %v272_v42 = vadd.f32 %v271_v41, %v264_v40 }
 0x185   :  { %273 = vadd.xlane.f32.xlu1 %v272_v42 }
 0x196   :  { %307 = vperm.xlu1 %362, %v303_v44  }
 0x20a   :  { %v269_v45 = vpop.xlane.xlu1 %268 }
 0x20b   :  { %v275_v46 = vmul.f32 0.001953125, %v269_v45 }
 0x20d   :  { %v279_v47 = vadd.f32 1e-05, %v275_v46 }
 0x20e   :  { %v274_v48 = vpop.xlane.xlu1 %273 }
 0x20f   :  { %363 = vrsqrt.f32 %v279_v47  ;;  %v276_v49 = vmul.f32 0.001953125, %v274_v48 }
 0x211   :  { %v280_v50 = vadd.f32 1e-05, %v276_v49 }
 0x212   :  { %v308_v58 = vpop.permute.xlu1 %307 }
 0x213   :  { %365 = vrsqrt.f32 %v280_v50 }
 0x21c   :  { %v364_v52 = vpop.eup %363 }
 0x21d   :  { %v283_v53 = vmul.f32 %v364_v52, %v277_v51 }
 0x21f   :  { %287 = vperm.xlu0 %361, %v283_v53  }
 0x220   :  { %v366_v55 = vpop.eup %365 }
 0x221   :  { %v284_v56 = vmul.f32 %v366_v55, %v278_v54 }
 0x223   :  { %292 = vperm.xlu1 %362, %v284_v56  }
 0x227   :  { %312 = vperm.xlu1 %362, %v304_v57  }
 0x29a   :  { %v288_v59 = vpop.permute.xlu0 %287 }
 0x29b   :  { %v295_v60 = vmul.f32 %v288_v59, %v249_v19  ;;  %v296_v61 = vmul.f32 %v288_v59, %v250_v20  ;;  %v297_v62 = vmul.f32 %v288_v59, %v251_v21  ;;  %v298_v63 = vmul.f32 %v288_v59, %v252_v23 }
 0x29d   :  { %v315_v0 = vadd.f32 %v308_v58, %v295_v60  ;;  %v316_v1 = vadd.f32 %v308_v58, %v296_v61  ;;  %v317_v2 = vadd.f32 %v308_v58, %v297_v62  ;;  %v318_v4 = vadd.f32 %v308_v58, %v298_v63 }
 0x29e   :  { %v293_v5 = vpop.permute.xlu1 %292 }
 0x29f   :  { %vm323_vm0 = vcmp.ge.f32.partialorder %v315_v0, 0.0  ;;  %vm324_vm1 = vcmp.ge.f32.partialorder %v316_v1, 0.0  ;;  %vm325_vm2 = vcmp.ge.f32.partialorder %v317_v2, 0.0  ;;  %vm326_vm3 = vcmp.ge.f32.partialorder %v318_v4, 0.0 }
 0x2a0   :  { %v331_v6 = vmul.f32 0.2, %v315_v0  ;;  %v332_v7 = vmul.f32 0.2, %v316_v1  ;;  %v333_v8 = vmul.f32 0.2, %v317_v2  ;;  %v299_v10 = vmul.f32 %v293_v5, %v253_v28 }
 0x2a1   :  { %v334_v9 = vmul.f32 0.2, %v318_v4  ;;  %v300_v11 = vmul.f32 %v293_v5, %v254_v29  ;;  %v301_v12 = vmul.f32 %v293_v5, %v255_v31  ;;  %v302_v16 = vmul.f32 %v293_v5, %v596_v34 }
 0x2a2   :  { %v339_v13 = vsel %vm323_vm0, %v315_v0, %v331_v6  ;;  %v340_v14 = vsel %vm324_vm1, %v316_v1, %v332_v7  ;;  %v341_v15 = vsel %vm325_vm2, %v317_v2, %v333_v8  ;;  %v313_v17 = vpop.permute.xlu1 %312 }
 0x2a3   :  { %v342_v18 = vsel %vm326_vm3, %v318_v4, %v334_v9  ;;  %347 = vst [vmem:[%s641_s4] sm:$0xff] %v339_v13  ;;  %348 = vst [vmem:[%s641_s4 + $0x8] sm:$0xff] %v340_v14  ;;  %v319_v3 = vadd.f32 %v313_v17, %v299_v10  ;;  %v320_v19 = vadd.f32 %v313_v17, %v300_v11 }
 0x2a4   :  { %349 = vst [vmem:[%s641_s4 + $0x10] sm:$0xff] %v341_v15  ;;  %v321_v20 = vadd.f32 %v313_v17, %v301_v12  ;;  %350 = vst [vmem:[%s641_s4 + $0x18] sm:$0xff] %v342_v18  ;;  %v322_v21 = vadd.f32 %v313_v17, %v302_v16 }
 0x2a5   :  { %vm327_vm4 = vcmp.ge.f32.partialorder %v319_v3, 0.0  ;;  %vm328_vm5 = vcmp.ge.f32.partialorder %v320_v19, 0.0  ;;  %v335_v22 = vmul.f32 0.2, %v319_v3  ;;  %v336_v23 = vmul.f32 0.2, %v320_v19 }
 0x2a6   :  { %vm329_vm6 = vcmp.ge.f32.partialorder %v321_v20, 0.0  ;;  %vm330_vm7 = vcmp.ge.f32.partialorder %v322_v21, 0.0  ;;  %v337_v24 = vmul.f32 0.2, %v321_v20  ;;  %v338_v25 = vmul.f32 0.2, %v322_v21 }
 0x2a7   :  { %v343_v26 = vsel %vm327_vm4, %v319_v3, %v335_v22  ;;  %v344_v27 = vsel %vm328_vm5, %v320_v19, %v336_v23 }
 0x2a8   :  { %v345_v28 = vsel %vm329_vm6, %v321_v20, %v337_v24  ;;  %351 = vst [vmem:[%s641_s4 + $0x20] sm:$0xff] %v343_v26  ;;  %v346_v29 = vsel %vm330_vm7, %v322_v21, %v338_v25  ;;  %352 = vst [vmem:[%s641_s4 + $0x28] sm:$0xff] %v344_v27 }
 0x2a9   :  { %353 = vst [vmem:[%s641_s4 + $0x30] sm:$0xff] %v345_v28  ;;  %354 = vst [vmem:[%s641_s4 + $0x38] sm:$0xff] %v346_v29 }

// kernel: discriminator_forward.7
= control target key start
LH: loop header
LB: loop body
LE: loop exit
PB: predicated region body
PF: predicated region fallthrough
CT: control target
= control target key end

     0   :  { %s551_s0 = inlined_call_operand.vmem [shape: f32[256,128], index: 0, kind: input, shape index: {}]   ;;  %s552_s1 = inlined_call_operand.vmem [shape: f32[32,256], index: 1, kind: input, shape index: {}]   ;;  %s553_s3 = inlined_call_operand.vmem [shape: f32[32,1], index: 3, kind: input, shape index: {}]   ;;  %s554_s2 = inlined_call_operand.vmem [shape: f32[32,1], index: 2, kind: input, shape index: {}]   ;;  %s555_s4 = inlined_call_operand.vmem [shape: f32[32,128], index: 4, kind: output, shape index: {}]  }
   0x1   :  { %v56_v0 = vld [vmem:[%s551_s0 + $0xf8] sm:$0xff]  ;;  %v55_v2 = vld [vmem:[%s551_s0 + $0xf0] sm:$0xff]  ;;  %v54_v4 = vld [vmem:[%s551_s0 + $0xe8] sm:$0xff] }
   0x2   :  { %v40_v1 = vld [vmem:[%s551_s0 + $0x78] sm:$0xff]  ;;  %262 = vmatprep.subr.mxu0 %v56_v0  ;;  %306 = vmatprep.subr.mxu1 %v56_v0  ;;  %v39_v3 = vld [vmem:[%s551_s0 + $0x70] sm:$0xff]  ;;  %v38_v5 = vld [vmem:[%s551_s0 + $0x68] sm:$0xff] }
   0x3   :  { %263 = vmatpush3.msra.mxu0 %v40_v1  ;;  %322 = vmatpush3.msra.mxu1 %v40_v1  ;;  %v53_v6 = vld [vmem:[%s551_s0 + $0xe0] sm:$0xff]  ;;  %v52_v8 = vld [vmem:[%s551_s0 + $0xd8] sm:$0xff]  ;;  %v51_v10 = vld [vmem:[%s551_s0 + $0xd0] sm:$0xff] }
   0x4   :  { %264 = vmatprep.subr.mxu0 %v55_v2  ;;  %307 = vmatprep.subr.mxu1 %v55_v2  ;;  %v37_v7 = vld [vmem:[%s551_s0 + $0x60] sm:$0xff]  ;;  %v36_v9 = vld [vmem:[%s551_s0 + $0x58] sm:$0xff]  ;;  %v35_v11 = vld [vmem:[%s551_s0 + $0x50] sm:$0xff] }
   0x5   :  { %265 = vmatpush3.msra.mxu0 %v39_v3  ;;  %323 = vmatpush3.msra.mxu1 %v39_v3  ;;  %v50_v12 = vld [vmem:[%s551_s0 + $0xc8] sm:$0xff]  ;;  %v49_v14 = vld [vmem:[%s551_s0 + $0xc0] sm:$0xff]  ;;  %v48_v16 = vld [vmem:[%s551_s0 + $0xb8] sm:$0xff] }
   0x6   :  { %266 = vmatprep.subr.mxu0 %v54_v4  ;;  %308 = vmatprep.subr.mxu1 %v54_v4  ;;  %v34_v13 = vld [vmem:[%s551_s0 + $0x48] sm:$0xff]  ;;  %v33_v15 = vld [vmem:[%s551_s0 + $0x40] sm:$0xff]  ;;  %v32_v17 = vld [vmem:[%s551_s0 + $0x38] sm:$0xff]  ;;  %v349_v4 = vmov 0  }
   0x7   :  { %267 = vmatpush3.msra.mxu0 %v38_v5  ;;  %324 = vmatpush3.msra.mxu1 %v38_v5  ;;  %v47_v18 = vld [vmem:[%s551_s0 + $0xb0] sm:$0xff]  ;;  %v46_v20 = vld [vmem:[%s551_s0 + $0xa8] sm:$0xff]  ;;  %v45_v22 = vld [vmem:[%s551_s0 + $0xa0] sm:$0xff] }
   0x8   :  { %268 = vmatprep.subr.mxu0 %v53_v6  ;;  %309 = vmatprep.subr.mxu1 %v53_v6  ;;  %v31_v19 = vld [vmem:[%s551_s0 + $0x30] sm:$0xff]  ;;  %v30_v21 = vld [vmem:[%s551_s0 + $0x28] sm:$0xff]  ;;  %v29_v23 = vld [vmem:[%s551_s0 + $0x20] sm:$0xff] }
   0x9   :  { %269 = vmatpush3.msra.mxu0 %v37_v7  ;;  %325 = vmatpush3.msra.mxu1 %v37_v7  ;;  %v44_v24 = vld [vmem:[%s551_s0 + $0x98] sm:$0xff]  ;;  %v43_v26 = vld [vmem:[%s551_s0 + $0x90] sm:$0xff]  ;;  %v42_v28 = vld [vmem:[%s551_s0 + $0x88] sm:$0xff] }
   0xa   :  { %270 = vmatprep.subr.mxu0 %v52_v8  ;;  %310 = vmatprep.subr.mxu1 %v52_v8  ;;  %v28_v25 = vld [vmem:[%s551_s0 + $0x18] sm:$0xff]  ;;  %v27_v27 = vld [vmem:[%s551_s0 + $0x10] sm:$0xff]  ;;  %v26_v29 = vld [vmem:[%s551_s0 + $0x8] sm:$0xff] }
   0xb   :  { %271 = vmatpush3.msra.mxu0 %v36_v9  ;;  %326 = vmatpush3.msra.mxu1 %v36_v9  ;;  %v41_v30 = vld [vmem:[%s551_s0 + $0x80] sm:$0xff]  ;;  %v18_v32 = vld [vmem:[%s552_s1 + $0x8] sm:$0xff]  ;;  %v20_v36 = vld [vmem:[%s552_s1 + $0x18] sm:$0xff] }
   0xc   :  { %272 = vmatprep.subr.mxu0 %v51_v10  ;;  %311 = vmatprep.subr.mxu1 %v51_v10  ;;  %v25_v31 = vld [vmem:[%s551_s0] sm:$0xff]  ;;  %v22_v33 = vld [vmem:[%s552_s1 + $0x28] sm:$0xff]  ;;  %v24_v37 = vld [vmem:[%s552_s1 + $0x38] sm:$0xff] }
   0xd   :  { %273 = vmatpush3.msra.mxu0 %v35_v11  ;;  %327 = vmatpush3.msra.mxu1 %v35_v11  ;;  %v17_v34 = vld [vmem:[%s552_s1] sm:$0xff]  ;;  %v19_v38 = vld [vmem:[%s552_s1 + $0x10] sm:$0xff]  ;;  %v215_v6 = vld [vmem:[%s553_s3 + $0x8] sm:$0xff] }
   0xe   :  { %274 = vmatprep.subr.mxu0 %v50_v12  ;;  %312 = vmatprep.subr.mxu1 %v50_v12  ;;  %v21_v35 = vld [vmem:[%s552_s1 + $0x20] sm:$0xff]  ;;  %v23_v39 = vld [vmem:[%s552_s1 + $0x30] sm:$0xff] }
   0xf   :  { %275 = vmatpush3.msra.mxu0 %v34_v13  ;;  %328 = vmatpush3.msra.mxu1 %v34_v13  ;;  %v214_v5 = vld [vmem:[%s553_s3] sm:$0xff]  ;;  %v216_v7 = vld [vmem:[%s553_s3 + $0x10] sm:$0xff] }
  0x10   :  { %276 = vmatprep.subr.mxu0 %v49_v14  ;;  %313 = vmatprep.subr.mxu1 %v49_v14 }
  0x11   :  { %277 = vmatpush3.msra.mxu0 %v33_v15  ;;  %329 = vmatpush3.msra.mxu1 %v33_v15 }
  0x12   :  { %278 = vmatprep.subr.mxu0 %v48_v16  ;;  %314 = vmatprep.subr.mxu1 %v48_v16 }
  0x13   :  { %279 = vmatpush3.msra.mxu0 %v32_v17  ;;  %330 = vmatpush3.msra.mxu1 %v32_v17 }
  0x14   :  { %280 = vmatprep.subr.mxu0 %v47_v18  ;;  %315 = vmatprep.subr.mxu1 %v47_v18 }
  0x15   :  { %281 = vmatpush3.msra.mxu0 %v31_v19  ;;  %331 = vmatpush3.msra.mxu1 %v31_v19 }
  0x16   :  { %282 = vmatprep.subr.mxu0 %v46_v20  ;;  %316 = vmatprep.subr.mxu1 %v46_v20  ;;  %v174_v20 = vld [vmem:[%s554_s2] sm:$0xff] }
  0x17   :  { %283 = vmatpush3.msra.mxu0 %v30_v21  ;;  %332 = vmatpush3.msra.mxu1 %v30_v21 }
  0x18   :  { %284 = vmatprep.subr.mxu0 %v45_v22  ;;  %317 = vmatprep.subr.mxu1 %v45_v22 }
  0x19   :  { %285 = vmatpush3.msra.mxu0 %v29_v23  ;;  %333 = vmatpush3.msra.mxu1 %v29_v23  ;;  %v176_v23 = vld [vmem:[%s554_s2 + $0x10] sm:$0xff] }
  0x1a   :  { %286 = vmatprep.subr.mxu0 %v44_v24  ;;  %318 = vmatprep.subr.mxu1 %v44_v24 }
  0x1b   :  { %287 = vmatpush3.msra.mxu0 %v28_v25  ;;  %334 = vmatpush3.msra.mxu1 %v28_v25 }
  0x1c   :  { %288 = vmatprep.subr.mxu0 %v43_v26  ;;  %319 = vmatprep.subr.mxu1 %v43_v26 }
  0x1d   :  { %289 = vmatpush3.msra.mxu0 %v27_v27  ;;  %335 = vmatpush3.msra.mxu1 %v27_v27  ;;  %v175_v27 = vld [vmem:[%s554_s2 + $0x8] sm:$0xff] }
  0x1e   :  { %290 = vmatprep.subr.mxu0 %v42_v28  ;;  %320 = vmatprep.subr.mxu1 %v42_v28 }
  0x1f   :  { %291 = vmatpush3.msra.mxu0 %v26_v29  ;;  %336 = vmatpush3.msra.mxu1 %v26_v29 }
  0x20   :  { %292 = vmatprep.subr.mxu0 %v41_v30  ;;  %321 = vmatprep.subr.mxu1 %v41_v30  ;;  %v177_v30 = vld [vmem:[%s554_s2 + $0x18] sm:$0xff] }
  0x21   :  { %293 = vmatpush3.msra.mxu0 %v25_v31  ;;  %337 = vmatpush3.msra.mxu1 %v25_v31 }
  0x22   :  { %121 = vmatprep.mubr.f32.mxu0 %v18_v32  ;;  %131 = vmatprep.mubr.f32.mxu1 %v22_v33  ;;  %v217_v32 = vld [vmem:[%s553_s3 + $0x18] sm:$0xff] }
  0x23   :  { %122 = vmatmul.mubr.f32.vlgmr.msra.gmra.mxu0 %v17_v34  ;;  %132 = vmatmul.mubr.f32.vlgmr.msra.gmra.mxu1 %v21_v35 }
  0x24   :  { %126 = vmatprep.mubr.f32.mxu0 %v20_v36  ;;  %136 = vmatprep.mubr.f32.mxu1 %v24_v37 }
  0x25   :  { %340 = vset.pattern.permute.xlu1 %v349_v4  ;;  %339 = vset.pattern.permute.xlu0 %v349_v4 }
  0x27   :  { %127 = vmatmul.mubr.f32.gmra.mxu0 %v19_v38  ;;  %137 = vmatmul.mubr.f32.gmra.mxu1 %v23_v39 }
  0xe3   :  { %v294_v40 = vpop.f32.mrf.mxu0  ;;  %v300_v41 = vpop.f32.mrf.mxu1 }
  0xe5   :  { %v295_v42 = vpop.f32.mrf.mxu0  ;;  %v301_v43 = vpop.f32.mrf.mxu1 }
  0xe6   :  { %v296_v44 = vadd.f32 %v295_v42, %v294_v40  ;;  %v302_v45 = vadd.f32 %v301_v43, %v300_v41 }
  0xe7   :  { %v297_v46 = vpop.f32.mrf.mxu0  ;;  %v303_v47 = vpop.f32.mrf.mxu1 }
  0xe8   :  { %146 = vadd.xlane.f32.xlu1 %v302_v45  ;;  %142 = vadd.xlane.f32.xlu0 %v296_v44 }
  0xe9   :  { %v298_v48 = vpop.f32.mrf.mxu0  ;;  %v304_v49 = vpop.f32.mrf.mxu1 }
  0xea   :  { %v299_v50 = vadd.f32 %v298_v48, %v297_v46  ;;  %v305_v51 = vadd.f32 %v304_v49, %v303_v47 }
  0xec   :  { %148 = vadd.xlane.f32.xlu1 %v305_v51  ;;  %144 = vadd.xlane.f32.xlu0 %v299_v50 }
 0x171   :  { %v147_v52 = vpop.xlane.xlu1 %146  ;;  %v143_v53 = vpop.xlane.xlu0 %142 }
 0x172   :  { %v152_v54 = vmul.f32 0.0078125, %v147_v52  ;;  %v150_v55 = vmul.f32 0.0078125, %v143_v53 }
 0x174   :  { %v495_v56 = vsub.f32 %v296_v44, %v150_v55  ;;  %v497_v59 = vsub.f32 %v302_v45, %v152_v54 }
 0x175   :  { %v149_v57 = vpop.xlane.xlu1 %148  ;;  %v145_v58 = vpop.xlane.xlu0 %144 }
 0x176   :  { %v153_v60 = vmul.f32 0.0078125, %v149_v57  ;;  %v151_v61 = vmul.f32 0.0078125, %v145_v58  ;;  %v158_v62 = vmul.f32 %v495_v56, %v495_v56  ;;  %v160_v1 = vmul.f32 %v497_v59, %v497_v59 }
 0x178   :  { %v501_v63 = vsub.f32 %v299_v50, %v151_v61  ;;  %162 = vadd.xlane.f32.xlu0 %v158_v62  ;;  %v503_v0 = vsub.f32 %v305_v51, %v153_v60 }
 0x17a   :  { %v159_v2 = vmul.f32 %v501_v63, %v501_v63  ;;  %v161_v3 = vmul.f32 %v503_v0, %v503_v0 }
 0x17c   :  { %166 = vadd.xlane.f32.xlu0 %v160_v1  ;;  %164 = vadd.xlane.f32.xlu1 %v159_v2 }
 0x180   :  { %168 = vadd.xlane.f32.xlu1 %v161_v3 }
 0x191   :  { %220 = vperm.xlu1 %340, %v214_v5  }
 0x195   :  { %225 = vperm.xlu1 %340, %v215_v6  }
 0x199   :  { %230 = vperm.xlu1 %340, %v216_v7  }
 0x201   :  { %v163_v8 = vpop.xlane.xlu0 %162 }
 0x202   :  { %v170_v9 = vmul.f32 0.0078125, %v163_v8 }
 0x204   :  { %v178_v10 = vadd.f32 1e-05, %v170_v9 }
 0x205   :  { %v165_v11 = vpop.xlane.xlu1 %164  ;;  %v167_v12 = vpop.xlane.xlu0 %166 }
 0x206   :  { %341 = vrsqrt.f32 %v178_v10  ;;  %v171_v13 = vmul.f32 0.0078125, %v165_v11  ;;  %v172_v14 = vmul.f32 0.0078125, %v167_v12 }
 0x208   :  { %v180_v15 = vadd.f32 1e-05, %v172_v14  ;;  %v179_v16 = vadd.f32 1e-05, %v171_v13 }
 0x209   :  { %v169_v17 = vpop.xlane.xlu1 %168 }
 0x20a   :  { %v173_v18 = vmul.f32 0.0078125, %v169_v17  ;;  %343 = vrsqrt.f32 %v180_v15 }
 0x20b   :  { %345 = vrsqrt.f32 %v179_v16 }
 0x20c   :  { %v181_v19 = vadd.f32 1e-05, %v173_v18 }
 0x20d   :  { %v221_v33 = vpop.permute.xlu1 %220 }
 0x20e   :  { %347 = vrsqrt.f32 %v181_v19 }
 0x211   :  { %v226_v34 = vpop.permute.xlu1 %225 }
 0x213   :  { %v342_v21 = vpop.eup %341 }
 0x214   :  { %v186_v22 = vmul.f32 %v342_v21, %v174_v20 }
 0x215   :  { %v231_v36 = vpop.permute.xlu1 %230 }
 0x216   :  { %192 = vperm.xlu0 %339, %v186_v22  }
 0x217   :  { %v344_v24 = vpop.eup %343 }
 0x218   :  { %v188_v25 = vmul.f32 %v344_v24, %v176_v23  ;;  %v346_v26 = vpop.eup %345 }
 0x219   :  { %v187_v28 = vmul.f32 %v346_v26, %v175_v27 }
 0x21a   :  { %202 = vperm.xlu1 %340, %v188_v25  }
 0x21b   :  { %v348_v29 = vpop.eup %347 }
 0x21c   :  { %v189_v31 = vmul.f32 %v348_v29, %v177_v30 }
 0x21e   :  { %197 = vperm.xlu1 %340, %v187_v28  }
 0x222   :  { %207 = vperm.xlu1 %340, %v189_v31  }
 0x226   :  { %235 = vperm.xlu1 %340, %v217_v32  }
 0x291   :  { %v193_v35 = vpop.permute.xlu0 %192 }
 0x292   :  { %v210_v37 = vmul.f32 %v193_v35, %v495_v56 }
 0x294   :  { %v238_v38 = vadd.f32 %v221_v33, %v210_v37 }
 0x295   :  { %v203_v40 = vpop.permute.xlu1 %202 }
 0x296   :  { %vm242_vm0 = vcmp.ge.f32.partialorder %v238_v38, 0.0  ;;  %v246_v39 = vmul.f32 0.2, %v238_v38  ;;  %v212_v41 = vmul.f32 %v203_v40, %v497_v59 }
 0x298   :  { %v250_v42 = vsel %vm242_vm0, %v238_v38, %v246_v39  ;;  %v240_v43 = vadd.f32 %v231_v36, %v212_v41 }
 0x299   :  { %254 = vst [vmem:[%s555_s4] sm:$0xff] %v250_v42  ;;  %v198_v44 = vpop.permute.xlu1 %197 }
 0x29a   :  { %vm244_vm1 = vcmp.ge.f32.partialorder %v240_v43, 0.0  ;;  %v248_v45 = vmul.f32 0.2, %v240_v43  ;;  %v211_v46 = vmul.f32 %v198_v44, %v501_v63 }
 0x29c   :  { %v252_v47 = vsel %vm244_vm1, %v240_v43, %v248_v45  ;;  %v239_v48 = vadd.f32 %v226_v34, %v211_v46 }
 0x29d   :  { %256 = vst [vmem:[%s555_s4 + $0x10] sm:$0xff] %v252_v47  ;;  %v208_v49 = vpop.permute.xlu1 %207 }
 0x29e   :  { %vm243_vm2 = vcmp.ge.f32.partialorder %v239_v48, 0.0  ;;  %v247_v50 = vmul.f32 0.2, %v239_v48  ;;  %v213_v52 = vmul.f32 %v208_v49, %v503_v0 }
 0x2a0   :  { %v251_v51 = vsel %vm243_vm2, %v239_v48, %v247_v50 }
 0x2a1   :  { %255 = vst [vmem:[%s555_s4 + $0x8] sm:$0xff] %v251_v51  ;;  %v236_v53 = vpop.permute.xlu1 %235 }
 0x2a2   :  { %v241_v54 = vadd.f32 %v236_v53, %v213_v52 }
 0x2a4   :  { %vm245_vm3 = vcmp.ge.f32.partialorder %v241_v54, 0.0  ;;  %v249_v55 = vmul.f32 0.2, %v241_v54 }
 0x2a6   :  { %v253_v56 = vsel %vm245_vm3, %v241_v54, %v249_v55 }
 0x2a7   :  { %257 = vst [vmem:[%s555_s4 + $0x18] sm:$0xff] %v253_v56 }

// kernel: discriminator_forward.8
= control target key start
LH: loop header
LB: loop body
LE: loop exit
PB: predicated region body
PF: predicated region fallthrough
CT: control target
= control target key end

     0   :  { %vm323_vm0 = vcmask 261120   ;;  %s1161_s0 = inlined_call_operand.vmem [shape: f32[512,32], index: 0, kind: input, shape index: {}]   ;;  %s1162_s1 = inlined_call_operand.vmem [shape: f32[64,512], index: 1, kind: input, shape index: {}]   ;;  %s1163_s3 = inlined_call_operand.vmem [shape: f32[64,1], index: 3, kind: input, shape index: {}]   ;;  %s1164_s2 = inlined_call_operand.vmem [shape: f32[64,1], index: 2, kind: input, shape index: {}]   ;;  %s1165_s4 = inlined_call_operand.vmem [shape: f32[64,32], index: 4, kind: output, shape index: {}]  }
   0x1   :  { %v80_v0 = vld [vmem:[%s1161_s0 + $0xf8] sm:$0xff]  ;;  %v79_v4 = vld [vmem:[%s1161_s0 + $0xf0] sm:$0xff]  ;;  %v78_v8 = vld [vmem:[%s1161_s0 + $0xe8] sm:$0xff] }
   0x2   :  { %v112_v1 = vld [vmem:[%s1161_s0 + $0x1f8] sm:$0xff]  ;;  %576 = vmatprep.subr.mxu0 %v80_v0  ;;  %v111_v5 = vld [vmem:[%s1161_s0 + $0x1f0] sm:$0xff]  ;;  %v110_v9 = vld [vmem:[%s1161_s0 + $0x1e8] sm:$0xff] }
   0x3   :  { %v64_v2 = vld [vmem:[%s1161_s0 + $0x78] sm:$0xff]  ;;  %632 = vmatprep.subr.mxu1 %v112_v1  ;;  %v63_v6 = vld [vmem:[%s1161_s0 + $0x70] sm:$0xff]  ;;  %v62_v10 = vld [vmem:[%s1161_s0 + $0x68] sm:$0xff] }
   0x4   :  { %v96_v3 = vld [vmem:[%s1161_s0 + $0x178] sm:$0xff]  ;;  %577 = vmatpush3.msra.mxu0 %v64_v2  ;;  %v95_v7 = vld [vmem:[%s1161_s0 + $0x170] sm:$0xff]  ;;  %v94_v11 = vld [vmem:[%s1161_s0 + $0x168] sm:$0xff] }
   0x5   :  { %633 = vmatpush3.msra.mxu1 %v96_v3  ;;  %578 = vmatprep.subr.mxu0 %v79_v4  ;;  %v77_v12 = vld [vmem:[%s1161_s0 + $0xe0] sm:$0xff]  ;;  %v76_v16 = vld [vmem:[%s1161_s0 + $0xd8] sm:$0xff]  ;;  %v75_v20 = vld [vmem:[%s1161_s0 + $0xd0] sm:$0xff] }
   0x6   :  { %634 = vmatprep.subr.mxu1 %v111_v5  ;;  %579 = vmatpush3.msra.mxu0 %v63_v6  ;;  %v109_v13 = vld [vmem:[%s1161_s0 + $0x1e0] sm:$0xff]  ;;  %v108_v17 = vld [vmem:[%s1161_s0 + $0x1d8] sm:$0xff]  ;;  %v107_v21 = vld [vmem:[%s1161_s0 + $0x1d0] sm:$0xff] }
   0x7   :  { %635 = vmatpush3.msra.mxu1 %v95_v7  ;;  %580 = vmatprep.subr.mxu0 %v78_v8  ;;  %v61_v14 = vld [vmem:[%s1161_s0 + $0x60] sm:$0xff]  ;;  %v60_v18 = vld [vmem:[%s1161_s0 + $0x58] sm:$0xff]  ;;  %v59_v22 = vld [vmem:[%s1161_s0 + $0x50] sm:$0xff] }
   0x8   :  { %636 = vmatprep.subr.mxu1 %v110_v9  ;;  %v93_v15 = vld [vmem:[%s1161_s0 + $0x160] sm:$0xff]  ;;  %581 = vmatpush3.msra.mxu0 %v62_v10  ;;  %v92_v19 = vld [vmem:[%s1161_s0 + $0x158] sm:$0xff]  ;;  %v91_v23 = vld [vmem:[%s1161_s0 + $0x150] sm:$0xff] }
   0x9   :  { %637 = vmatpush3.msra.mxu1 %v94_v11  ;;  %582 = vmatprep.subr.mxu0 %v77_v12  ;;  %v74_v24 = vld [vmem:[%s1161_s0 + $0xc8] sm:$0xff]  ;;  %v73_v28 = vld [vmem:[%s1161_s0 + $0xc0] sm:$0xff]  ;;  %v72_v32 = vld [vmem:[%s1161_s0 + $0xb8] sm:$0xff] }
   0xa   :  { %638 = vmatprep.subr.mxu1 %v109_v13  ;;  %583 = vmatpush3.msra.mxu0 %v61_v14  ;;  %v106_v25 = vld [vmem:[%s1161_s0 + $0x1c8] sm:$0xff]  ;;  %v105_v29 = vld [vmem:[%s1161_s0 + $0x1c0] sm:$0xff]  ;;  %v104_v33 = vld [vmem:[%s1161_s0 + $0x1b8] sm:$0xff] }
   0xb   :  { %639 = vmatpush3.msra.mxu1 %v93_v15  ;;  %584 = vmatprep.subr.mxu0 %v76_v16  ;;  %v58_v26 = vld [vmem:[%s1161_s0 + $0x48] sm:$0xff]  ;;  %v57_v30 = vld [vmem:[%s1161_s0 + $0x40] sm:$0xff]  ;;  %v56_v34 = vld [vmem:[%s1161_s0 + $0x38] sm:$0xff] }
   0xc   :  { %640 = vmatprep.subr.mxu1 %v108_v17  ;;  %585 = vmatpush3.msra.mxu0 %v60_v18  ;;  %v90_v27 = vld [vmem:[%s1161_s0 + $0x148] sm:$0xff]  ;;  %v89_v31 = vld [vmem:[%s1161_s0 + $0x140] sm:$0xff]  ;;  %v88_v35 = vld [vmem:[%s1161_s0 + $0x138] sm:$0xff] }
   0xd   :  { %641 = vmatpush3.msra.mxu1 %v92_v19  ;;  %586 = vmatprep.subr.mxu0 %v75_v20  ;;  %v71_v36 = vld [vmem:[%s1161_s0 + $0xb0] sm:$0xff]  ;;  %v70_v40 = vld [vmem:[%s1161_s0 + $0xa8] sm:$0xff]  ;;  %v69_v44 = vld [vmem:[%s1161_s0 + $0xa0] sm:$0xff] }
   0xe   :  { %642 = vmatprep.subr.mxu1 %v107_v21  ;;  %587 = vmatpush3.msra.mxu0 %v59_v22  ;;  %v103_v37 = vld [vmem:[%s1161_s0 + $0x1b0] sm:$0xff]  ;;  %v102_v41 = vld [vmem:[%s1161_s0 + $0x1a8] sm:$0xff]  ;;  %v101_v45 = vld [vmem:[%s1161_s0 + $0x1a0] sm:$0xff] }
   0xf   :  { %643 = vmatpush3.msra.mxu1 %v91_v23  ;;  %588 = vmatprep.subr.mxu0 %v74_v24  ;;  %v55_v38 = vld [vmem:[%s1161_s0 + $0x30] sm:$0xff]  ;;  %v54_v42 = vld [vmem:[%s1161_s0 + $0x28] sm:$0xff]  ;;  %v53_v46 = vld [vmem:[%s1161_s0 + $0x20] sm:$0xff] }
  0x10   :  { %644 = vmatprep.subr.mxu1 %v106_v25  ;;  %589 = vmatpush3.msra.mxu0 %v58_v26  ;;  %v87_v39 = vld [vmem:[%s1161_s0 + $0x130] sm:$0xff]  ;;  %v86_v43 = vld [vmem:[%s1161_s0 + $0x128] sm:$0xff]  ;;  %v85_v47 = vld [vmem:[%s1161_s0 + $0x120] sm:$0xff] }
  0x11   :  { %645 = vmatpush3.msra.mxu1 %v90_v27  ;;  %590 = vmatprep.subr.mxu0 %v73_v28  ;;  %v68_v48 = vld [vmem:[%s1161_s0 + $0x98] sm:$0xff]  ;;  %v67_v52 = vld [vmem:[%s1161_s0 + $0x90] sm:$0xff]  ;;  %v66_v56 = vld [vmem:[%s1161_s0 + $0x88] sm:$0xff] }
  0x12   :  { %646 = vmatprep.subr.mxu1 %v105_v29  ;;  %591 = vmatpush3.msra.mxu0 %v57_v30  ;;  %v100_v49 = vld [vmem:[%s1161_s0 + $0x198] sm:$0xff]  ;;  %v99_v53 = vld [vmem:[%s1161_s0 + $0x190] sm:$0xff]  ;;  %v98_v57 = vld [vmem:[%s1161_s0 + $0x188] sm:$0xff] }
  0x13   :  { %647 = vmatpush3.msra.mxu1 %v89_v31  ;;  %592 = vmatprep.subr.mxu0 %v72_v32  ;;  %v52_v50 = vld [vmem:[%s1161_s0 + $0x18] sm:$0xff]  ;;  %v51_v54 = vld [vmem:[%s1161_s0 + $0x10] sm:$0xff]  ;;  %v50_v58 = vld [vmem:[%s1161_s0 + $0x8] sm:$0xff] }
  0x14   :  { %648 = vmatprep.subr.mxu1 %v104_v33  ;;  %593 = vmatpush3.msra.mxu0 %v56_v34  ;;  %v84_v51 = vld [vmem:[%s1161_s0 + $0x118] sm:$0xff]  ;;  %v83_v55 = vld [vmem:[%s1161_s0 + $0x110] sm:$0xff]  ;;  %v82_v59 = vld [vmem:[%s1161_s0 + $0x108] sm:$0xff] }
  0x15   :  { %649 = vmatpush3.msra.mxu1 %v88_v35  ;;  %594 = vmatprep.subr.mxu0 %v71_v36  ;;  %v65_v60 = vld [vmem:[%s1161_s0 + $0x80] sm:$0xff]  ;;  %v18_v63 = vld [vmem:[%s1162_s1 + $0x8] sm:$0xff]  ;;  %v20_v1 = vld [vmem:[%s1162_s1 + $0x18] sm:$0xff] }
  0x16   :  { %650 = vmatprep.subr.mxu1 %v103_v37  ;;  %595 = vmatpush3.msra.mxu0 %v55_v38  ;;  %v97_v61 = vld [vmem:[%s1161_s0 + $0x180] sm:$0xff]  ;;  %v19_v3 = vld [vmem:[%s1162_s1 + $0x10] sm:$0xff]  ;;  %v22_v4 = vld [vmem:[%s1162_s1 + $0x28] sm:$0xff] }
  0x17   :  { %651 = vmatpush3.msra.mxu1 %v87_v39  ;;  %596 = vmatprep.subr.mxu0 %v70_v40  ;;  %v49_v62 = vld [vmem:[%s1161_s0] sm:$0xff]  ;;  %v24_v5 = vld [vmem:[%s1162_s1 + $0x38] sm:$0xff]  ;;  %v23_v7 = vld [vmem:[%s1162_s1 + $0x30] sm:$0xff] }
  0x18   :  { %652 = vmatprep.subr.mxu1 %v102_v41  ;;  %597 = vmatpush3.msra.mxu0 %v54_v42  ;;  %v81_v0 = vld [vmem:[%s1161_s0 + $0x100] sm:$0xff]  ;;  %v26_v8 = vld [vmem:[%s1162_s1 + $0x48] sm:$0xff]  ;;  %v28_v9 = vld [vmem:[%s1162_s1 + $0x58] sm:$0xff] }
  0x19   :  { %653 = vmatpush3.msra.mxu1 %v86_v43  ;;  %598 = vmatprep.subr.mxu0 %v69_v44  ;;  %v17_v2 = vld [vmem:[%s1162_s1] sm:$0xff]  ;;  %v27_v11 = vld [vmem:[%s1162_s1 + $0x50] sm:$0xff]  ;;  %v30_v12 = vld [vmem:[%s1162_s1 + $0x68] sm:$0xff] }
  0x1a   :  { %654 = vmatprep.subr.mxu1 %v101_v45  ;;  %599 = vmatpush3.msra.mxu0 %v53_v46  ;;  %v21_v6 = vld [vmem:[%s1162_s1 + $0x20] sm:$0xff]  ;;  %v32_v13 = vld [vmem:[%s1162_s1 + $0x78] sm:$0xff]  ;;  %v31_v15 = vld [vmem:[%s1162_s1 + $0x70] sm:$0xff] }
  0x1b   :  { %655 = vmatpush3.msra.mxu1 %v85_v47  ;;  %600 = vmatprep.subr.mxu0 %v68_v48  ;;  %v25_v10 = vld [vmem:[%s1162_s1 + $0x40] sm:$0xff]  ;;  %v34_v16 = vld [vmem:[%s1162_s1 + $0x88] sm:$0xff]  ;;  %v36_v17 = vld [vmem:[%s1162_s1 + $0x98] sm:$0xff] }
  0x1c   :  { %656 = vmatprep.subr.mxu1 %v100_v49  ;;  %601 = vmatpush3.msra.mxu0 %v52_v50  ;;  %v29_v14 = vld [vmem:[%s1162_s1 + $0x60] sm:$0xff]  ;;  %v35_v19 = vld [vmem:[%s1162_s1 + $0x90] sm:$0xff]  ;;  %v38_v20 = vld [vmem:[%s1162_s1 + $0xa8] sm:$0xff] }
  0x1d   :  { %657 = vmatpush3.msra.mxu1 %v84_v51  ;;  %602 = vmatprep.subr.mxu0 %v67_v52  ;;  %v33_v18 = vld [vmem:[%s1162_s1 + $0x80] sm:$0xff]  ;;  %v40_v21 = vld [vmem:[%s1162_s1 + $0xb8] sm:$0xff]  ;;  %v39_v23 = vld [vmem:[%s1162_s1 + $0xb0] sm:$0xff] }
  0x1e   :  { %658 = vmatprep.subr.mxu1 %v99_v53  ;;  %603 = vmatpush3.msra.mxu0 %v51_v54  ;;  %v37_v22 = vld [vmem:[%s1162_s1 + $0xa0] sm:$0xff]  ;;  %v42_v24 = vld [vmem:[%s1162_s1 + $0xc8] sm:$0xff]  ;;  %v44_v25 = vld [vmem:[%s1162_s1 + $0xd8] sm:$0xff] }
  0x1f   :  { %659 = vmatpush3.msra.mxu1 %v83_v55  ;;  %604 = vmatprep.subr.mxu0 %v66_v56  ;;  %v41_v26 = vld [vmem:[%s1162_s1 + $0xc0] sm:$0xff]  ;;  %v43_v27 = vld [vmem:[%s1162_s1 + $0xd0] sm:$0xff]  ;;  %v46_v28 = vld [vmem:[%s1162_s1 + $0xe8] sm:$0xff] }
  0x20   :  { %660 = vmatprep.subr.mxu1 %v98_v57  ;;  %605 = vmatpush3.msra.mxu0 %v50_v58  ;;  %v48_v29 = vld [vmem:[%s1162_s1 + $0xf8] sm:$0xff]  ;;  %v45_v30 = vld [vmem:[%s1162_s1 + $0xe0] sm:$0xff]  ;;  %v47_v31 = vld [vmem:[%s1162_s1 + $0xf0] sm:$0xff] }
  0x21   :  { %661 = vmatpush3.msra.mxu1 %v82_v59  ;;  %606 = vmatprep.subr.mxu0 %v65_v60 }
  0x22   :  { %662 = vmatprep.subr.mxu1 %v97_v61  ;;  %607 = vmatpush3.msra.mxu0 %v49_v62 }
  0x23   :  { %177 = vmatprep.mubr.f32.mxu0 %v18_v63  ;;  %663 = vmatpush3.msra.mxu1 %v81_v0 }
  0x24   :  { %282 = vmatprep.mubr.f32.mxu1 %v20_v1  ;;  %178 = vmatmul.mubr.f32.vlgmr.msra.gmra.mxu0 %v17_v2 }
  0x25   :  { %283 = vmatmul.mubr.f32.vlgmr.msra.gmra.mxu1 %v19_v3  ;;  %182 = vmatprep.mubr.f32.mxu0 %v22_v4 }
  0x26   :  { %287 = vmatprep.mubr.f32.mxu1 %v24_v5 }
  0x28   :  { %183 = vmatmul.mubr.f32.gmra.mxu0 %v21_v6 }
  0x29   :  { %288 = vmatmul.mubr.f32.gmra.mxu1 %v23_v7  ;;  %187 = vmatprep.mubr.f32.mxu0 %v26_v8 }
  0x2a   :  { %292 = vmatprep.mubr.f32.mxu1 %v28_v9 }
  0x2c   :  { %188 = vmatmul.mubr.f32.gmra.mxu0 %v25_v10 }
  0x2d   :  { %293 = vmatmul.mubr.f32.gmra.mxu1 %v27_v11  ;;  %192 = vmatprep.mubr.f32.mxu0 %v30_v12 }
  0x2e   :  { %297 = vmatprep.mubr.f32.mxu1 %v32_v13 }
  0x30   :  { %193 = vmatmul.mubr.f32.gmra.mxu0 %v29_v14 }
  0x31   :  { %298 = vmatmul.mubr.f32.gmra.mxu1 %v31_v15  ;;  %197 = vmatprep.mubr.f32.mxu0 %v34_v16 }
  0x32   :  { %302 = vmatprep.mubr.f32.mxu1 %v36_v17 }
  0x34   :  { %198 = vmatmul.mubr.f32.gmra.mxu0 %v33_v18 }
  0x35   :  { %303 = vmatmul.mubr.f32.gmra.mxu1 %v35_v19  ;;  %202 = vmatprep.mubr.f32.mxu0 %v38_v20 }
  0x36   :  { %307 = vmatprep.mubr.f32.mxu1 %v40_v21 }
  0x38   :  { %203 = vmatmul.mubr.f32.gmra.mxu0 %v37_v22 }
  0x39   :  { %308 = vmatmul.mubr.f32.gmra.mxu1 %v39_v23  ;;  %207 = vmatprep.mubr.f32.mxu0 %v42_v24 }
  0x3a   :  { %312 = vmatprep.mubr.f32.mxu1 %v44_v25 }
  0x3c   :  { %208 = vmatmul.mubr.f32.gmra.mxu0 %v41_v26 }
  0x3d   :  { %313 = vmatmul.mubr.f32.gmra.mxu1 %v43_v27  ;;  %212 = vmatprep.mubr.f32.mxu0 %v46_v28 }
  0x3e   :  { %317 = vmatprep.mubr.f32.mxu1 %v48_v29 }
  0x40   :  { %213 = vmatmul.mubr.f32.gmra.mxu0 %v45_v30 }
  0x41   :  { %318 = vmatmul.mubr.f32.gmra.mxu1 %v47_v31 }
  0xe4   :  { %v608_v32 = vpop.f32.mrf.mxu0 }
  0xe5   :  { %v664_v33 = vpop.f32.mrf.mxu1 }
  0xe6   :  { %v609_v34 = vpop.f32.mrf.mxu0 }
  0xe7   :  { %v665_v35 = vpop.f32.mrf.mxu1  ;;  %v610_v36 = vadd.f32 %v609_v34, %v608_v32 }
  0xe8   :  { %v666_v37 = vadd.f32 %v665_v35, %v664_v33  ;;  %v611_v38 = vpop.f32.mrf.mxu0 }
  0xe9   :  { %v667_v39 = vpop.f32.mrf.mxu1 }
  0xea   :  { %v1021_v40 = vadd.f32 %v666_v37, %v610_v36  ;;  %v612_v41 = vpop.f32.mrf.mxu0 }
  0xeb   :  { %v668_v42 = vpop.f32.mrf.mxu1  ;;  %v613_v43 = vadd.f32 %v612_v41, %v611_v38 }
  0xec   :  { %v669_v44 = vadd.f32 %v668_v42, %v667_v39  ;;  %v324_v45 = vsel %vm323_vm0, %v1021_v40, 0.0  ;;  %v614_v46 = vpop.f32.mrf.mxu0 }
  0xed   :  { %v670_v47 = vpop.f32.mrf.mxu1  ;;  %325 = vadd.xlane.f32.xlu0 %v324_v45 }
  0xee   :  { %v290_v48 = vadd.f32 %v669_v44, %v613_v43  ;;  %v615_v49 = vpop.f32.mrf.mxu0 }
  0xef   :  { %v671_v50 = vpop.f32.mrf.mxu1  ;;  %v616_v51 = vadd.f32 %v615_v49, %v614_v46 }
  0xf0   :  { %v672_v52 = vadd.f32 %v671_v50, %v670_v47  ;;  %v327_v53 = vsel %vm323_vm0, %v290_v48, 0.0  ;;  %v617_v54 = vpop.f32.mrf.mxu0 }
  0xf1   :  { %v673_v55 = vpop.f32.mrf.mxu1  ;;  %328 = vadd.xlane.f32.xlu0 %v327_v53 }
  0xf2   :  { %v295_v56 = vadd.f32 %v672_v52, %v616_v51  ;;  %v618_v57 = vpop.f32.mrf.mxu0 }
  0xf3   :  { %v674_v58 = vpop.f32.mrf.mxu1  ;;  %v619_v59 = vadd.f32 %v618_v57, %v617_v54 }
  0xf4   :  { %v675_v60 = vadd.f32 %v674_v58, %v673_v55  ;;  %v330_v61 = vsel %vm323_vm0, %v295_v56, 0.0  ;;  %v620_v62 = vpop.f32.mrf.mxu0  ;;  %v707_v58 = vmov 0  }
  0xf5   :  { %v676_v63 = vpop.f32.mrf.mxu1  ;;  %331 = vadd.xlane.f32.xlu1 %v330_v61  ;;  %690 = vset.pattern.permute.xlu0 %v707_v58 }
  0xf6   :  { %v300_v0 = vadd.f32 %v675_v60, %v619_v59  ;;  %v621_v1 = vpop.f32.mrf.mxu0  ;;  %689 = vset.pattern.permute.xlu1 %v707_v58 }
  0xf7   :  { %v677_v2 = vpop.f32.mrf.mxu1  ;;  %v622_v3 = vadd.f32 %v621_v1, %v620_v62 }
  0xf8   :  { %v678_v4 = vadd.f32 %v677_v2, %v676_v63  ;;  %v333_v5 = vsel %vm323_vm0, %v300_v0, 0.0  ;;  %v623_v6 = vpop.f32.mrf.mxu0 }
  0xf9   :  { %v679_v7 = vpop.f32.mrf.mxu1  ;;  %334 = vadd.xlane.f32.xlu1 %v333_v5 }
  0xfa   :  { %v305_v8 = vadd.f32 %v678_v4, %v622_v3  ;;  %v624_v9 = vpop.f32.mrf.mxu0 }
  0xfb   :  { %v680_v10 = vpop.f32.mrf.mxu1  ;;  %v625_v11 = vadd.f32 %v624_v9, %v623_v6  ;;  %v484_v9 = vld [vmem:[%s1163_s3] sm:$0xff] }
  0xfc   :  { %v681_v12 = vadd.f32 %v680_v10, %v679_v7  ;;  %v336_v13 = vsel %vm323_vm0, %v305_v8, 0.0  ;;  %v626_v14 = vpop.f32.mrf.mxu0  ;;  %v485_v10 = vld [vmem:[%s1163_s3 + $0x8] sm:$0xff] }
  0xfd   :  { %v682_v15 = vpop.f32.mrf.mxu1  ;;  %337 = vadd.xlane.f32.xlu0 %v336_v13  ;;  %v488_v13 = vld [vmem:[%s1163_s3 + $0x20] sm:$0xff] }
  0xfe   :  { %v310_v16 = vadd.f32 %v681_v12, %v625_v11  ;;  %v627_v17 = vpop.f32.mrf.mxu0  ;;  %v486_v11 = vld [vmem:[%s1163_s3 + $0x10] sm:$0xff]  ;;  %v487_v12 = vld [vmem:[%s1163_s3 + $0x18] sm:$0xff] }
  0xff   :  { %v683_v18 = vpop.f32.mrf.mxu1  ;;  %v628_v19 = vadd.f32 %v627_v17, %v626_v14  ;;  %v489_v14 = vld [vmem:[%s1163_s3 + $0x28] sm:$0xff] }
 0x100   :  { %v684_v20 = vadd.f32 %v683_v18, %v682_v15  ;;  %v339_v21 = vsel %vm323_vm0, %v310_v16, 0.0  ;;  %v629_v22 = vpop.f32.mrf.mxu0 }
 0x101   :  { %v685_v23 = vpop.f32.mrf.mxu1  ;;  %340 = vadd.xlane.f32.xlu1 %v339_v21 }
 0x102   :  { %v315_v24 = vadd.f32 %v684_v20, %v628_v19  ;;  %v630_v25 = vpop.f32.mrf.mxu0 }
 0x103   :  { %v686_v26 = vpop.f32.mrf.mxu1  ;;  %v631_v27 = vadd.f32 %v630_v25, %v629_v22 }
 0x104   :  { %v687_v28 = vadd.f32 %v686_v26, %v685_v23  ;;  %v342_v29 = vsel %vm323_vm0, %v315_v24, 0.0 }
 0x105   :  { %343 = vadd.xlane.f32.xlu0 %v342_v29 }
 0x106   :  { %v320_v30 = vadd.f32 %v687_v28, %v631_v27  ;;  %v404_v28 = vld [vmem:[%s1164_s2] sm:$0xff] }
 0x108   :  { %v345_v31 = vsel %vm323_vm0, %v320_v30, 0.0 }
 0x109   :  { %346 = vadd.xlane.f32.xlu1 %v345_v31 }
 0x176   :  { %v326_v32 = vpop.xlane.xlu0 %325 }
 0x177   :  { %v348_v33 = vmul.f32 0.03125, %v326_v32 }
 0x179   :  { %v1033_v34 = vsub.f32 %v1021_v40, %v348_v33 }
 0x17a   :  { %v329_v35 = vpop.xlane.xlu0 %328 }
 0x17b   :  { %v349_v36 = vmul.f32 0.03125, %v329_v35  ;;  %v364_v37 = vmul.f32 %v1033_v34, %v1033_v34  ;;  %v405_v35 = vld [vmem:[%s1164_s2 + $0x8] sm:$0xff] }
 0x17d   :  { %v1037_v38 = vsub.f32 %v290_v48, %v349_v36  ;;  %v372_v39 = vsel %vm323_vm0, %v364_v37, 0.0 }
 0x17e   :  { %v332_v41 = vpop.xlane.xlu1 %331  ;;  %373 = vadd.xlane.f32.xlu0 %v372_v39  ;;  %v491_v39 = vld [vmem:[%s1163_s3 + $0x38] sm:$0xff] }
 0x17f   :  { %v350_v42 = vmul.f32 0.03125, %v332_v41  ;;  %v365_v43 = vmul.f32 %v1037_v38, %v1037_v38 }
 0x181   :  { %v1042_v44 = vsub.f32 %v295_v56, %v350_v42  ;;  %v375_v40 = vsel %vm323_vm0, %v365_v43, 0.0 }
 0x182   :  { %v335_v45 = vpop.xlane.xlu1 %334  ;;  %376 = vadd.xlane.f32.xlu1 %v375_v40  ;;  %v406_v40 = vld [vmem:[%s1164_s2 + $0x10] sm:$0xff] }
 0x183   :  { %v351_v46 = vmul.f32 0.03125, %v335_v45  ;;  %v366_v47 = vmul.f32 %v1042_v44, %v1042_v44 }
 0x185   :  { %v1047_v48 = vsub.f32 %v300_v0, %v351_v46  ;;  %v378_v49 = vsel %vm323_vm0, %v366_v47, 0.0 }
 0x186   :  { %379 = vadd.xlane.f32.xlu0 %v378_v49  ;;  %v338_v50 = vpop.xlane.xlu0 %337 }
 0x187   :  { %v352_v51 = vmul.f32 0.03125, %v338_v50  ;;  %v367_v52 = vmul.f32 %v1047_v48, %v1047_v48 }
 0x189   :  { %v1052_v53 = vsub.f32 %v305_v8, %v352_v51  ;;  %v381_v54 = vsel %vm323_vm0, %v367_v52, 0.0  ;;  %v407_v51 = vld [vmem:[%s1164_s2 + $0x18] sm:$0xff] }
 0x18a   :  { %v341_v55 = vpop.xlane.xlu1 %340  ;;  %382 = vadd.xlane.f32.xlu1 %v381_v54 }
 0x18b   :  { %v353_v56 = vmul.f32 0.03125, %v341_v55  ;;  %v368_v57 = vmul.f32 %v1052_v53, %v1052_v53 }
 0x18d   :  { %v1057_v59 = vsub.f32 %v310_v16, %v353_v56  ;;  %v384_v60 = vsel %vm323_vm0, %v368_v57, 0.0  ;;  %v408_v57 = vld [vmem:[%s1164_s2 + $0x20] sm:$0xff] }
 0x18e   :  { %385 = vadd.xlane.f32.xlu0 %v384_v60  ;;  %v344_v61 = vpop.xlane.xlu0 %343 }
 0x18f   :  { %v354_v62 = vmul.f32 0.03125, %v344_v61  ;;  %v369_v63 = vmul.f32 %v1057_v59, %v1057_v59  ;;  %v409_v61 = vld [vmem:[%s1164_s2 + $0x28] sm:$0xff] }
 0x191   :  { %v1062_v0 = vsub.f32 %v315_v24, %v354_v62  ;;  %v387_v1 = vsel %vm323_vm0, %v369_v63, 0.0 }
 0x192   :  { %v347_v2 = vpop.xlane.xlu1 %346  ;;  %388 = vadd.xlane.f32.xlu1 %v387_v1  ;;  %v410_v1 = vld [vmem:[%s1164_s2 + $0x30] sm:$0xff] }
 0x193   :  { %v355_v3 = vmul.f32 0.03125, %v347_v2  ;;  %v370_v4 = vmul.f32 %v1062_v0, %v1062_v0 }
 0x195   :  { %v1067_v5 = vsub.f32 %v320_v30, %v355_v3  ;;  %v390_v6 = vsel %vm323_vm0, %v370_v4, 0.0  ;;  %v411_v4 = vld [vmem:[%s1164_s2 + $0x38] sm:$0xff] }
 0x196   :  { %391 = vadd.xlane.f32.xlu0 %v390_v6 }
 0x197   :  { %v371_v7 = vmul.f32 %v1067_v5, %v1067_v5 }
 0x199   :  { %v393_v8 = vsel %vm323_vm0, %v371_v7, 0.0 }
 0x19a   :  { %394 = vadd.xlane.f32.xlu1 %v393_v8  ;;  %v490_v8 = vld [vmem:[%s1163_s3 + $0x30] sm:$0xff] }
 0x1ab   :  { %494 = vperm.xlu1 %689, %v484_v9  }
 0x1ac   :  { %499 = vperm.xlu0 %690, %v485_v10  }
 0x1af   :  { %504 = vperm.xlu1 %689, %v486_v11  }
 0x1b0   :  { %509 = vperm.xlu0 %690, %v487_v12  }
 0x1b3   :  { %514 = vperm.xlu1 %689, %v488_v13  }
 0x1b4   :  { %519 = vperm.xlu0 %690, %v489_v14  }
 0x207   :  { %v374_v15 = vpop.xlane.xlu0 %373 }
 0x208   :  { %v396_v16 = vmul.f32 0.03125, %v374_v15 }
 0x20a   :  { %v412_v17 = vadd.f32 1e-05, %v396_v16 }
 0x20b   :  { %v377_v18 = vpop.xlane.xlu1 %376 }
 0x20c   :  { %691 = vrsqrt.f32 %v412_v17  ;;  %v397_v19 = vmul.f32 0.03125, %v377_v18 }
 0x20e   :  { %v413_v20 = vadd.f32 1e-05, %v397_v19 }
 0x20f   :  { %v380_v21 = vpop.xlane.xlu0 %379 }
 0x210   :  { %693 = vrsqrt.f32 %v413_v20  ;;  %v398_v22 = vmul.f32 0.03125, %v380_v21 }
 0x212   :  { %v414_v23 = vadd.f32 1e-05, %v398_v22 }
 0x213   :  { %v383_v24 = vpop.xlane.xlu1 %382 }
 0x214   :  { %695 = vrsqrt.f32 %v414_v23  ;;  %v399_v25 = vmul.f32 0.03125, %v383_v24 }
 0x216   :  { %v415_v26 = vadd.f32 1e-05, %v399_v25 }
 0x217   :  { %v386_v27 = vpop.xlane.xlu0 %385 }
 0x218   :  { %697 = vrsqrt.f32 %v415_v26  ;;  %v400_v29 = vmul.f32 0.03125, %v386_v27 }
 0x219   :  { %v692_v30 = vpop.eup %691 }
 0x21a   :  { %v416_v31 = vadd.f32 1e-05, %v400_v29  ;;  %v428_v32 = vmul.f32 %v692_v30, %v404_v28 }
 0x21b   :  { %v389_v33 = vpop.xlane.xlu1 %388 }
 0x21c   :  { %699 = vrsqrt.f32 %v416_v31  ;;  %v401_v36 = vmul.f32 0.03125, %v389_v33  ;;  %438 = vperm.xlu0 %690, %v428_v32  }
 0x21d   :  { %v694_v37 = vpop.eup %693 }
 0x21e   :  { %v417_v41 = vadd.f32 1e-05, %v401_v36  ;;  %v429_v42 = vmul.f32 %v694_v37, %v405_v35 }
 0x21f   :  { %v392_v43 = vpop.xlane.xlu0 %391 }
 0x220   :  { %701 = vrsqrt.f32 %v417_v41  ;;  %v402_v45 = vmul.f32 0.03125, %v392_v43  ;;  %443 = vperm.xlu1 %689, %v429_v42   ;;  %529 = vperm.xlu0 %690, %v491_v39  }
 0x221   :  { %v696_v46 = vpop.eup %695 }
 0x222   :  { %v418_v47 = vadd.f32 1e-05, %v402_v45  ;;  %v430_v49 = vmul.f32 %v696_v46, %v406_v40 }
 0x223   :  { %v395_v50 = vpop.xlane.xlu1 %394 }
 0x224   :  { %703 = vrsqrt.f32 %v418_v47  ;;  %v403_v52 = vmul.f32 0.03125, %v395_v50  ;;  %448 = vperm.xlu1 %689, %v430_v49  }
 0x225   :  { %v698_v54 = vpop.eup %697 }
 0x226   :  { %v419_v55 = vadd.f32 1e-05, %v403_v52  ;;  %v431_v56 = vmul.f32 %v698_v54, %v407_v51 }
 0x227   :  { %v500_v9 = vpop.permute.xlu0 %499  ;;  %v495_v10 = vpop.permute.xlu1 %494 }
 0x228   :  { %705 = vrsqrt.f32 %v419_v55  ;;  %453 = vperm.xlu1 %689, %v431_v56  }
 0x229   :  { %v700_v58 = vpop.eup %699 }
 0x22a   :  { %v432_v60 = vmul.f32 %v700_v58, %v408_v57 }
 0x22b   :  { %v510_v11 = vpop.permute.xlu0 %509  ;;  %v505_v12 = vpop.permute.xlu1 %504 }
 0x22c   :  { %458 = vperm.xlu1 %689, %v432_v60  }
 0x22d   :  { %v702_v62 = vpop.eup %701 }
 0x22e   :  { %v433_v63 = vmul.f32 %v702_v62, %v409_v61 }
 0x22f   :  { %v520_v13 = vpop.permute.xlu0 %519  ;;  %v515_v14 = vpop.permute.xlu1 %514 }
 0x230   :  { %463 = vperm.xlu1 %689, %v433_v63  }
 0x231   :  { %v704_v2 = vpop.eup %703 }
 0x232   :  { %v434_v3 = vmul.f32 %v704_v2, %v410_v1 }
 0x234   :  { %468 = vperm.xlu1 %689, %v434_v3  }
 0x235   :  { %v706_v6 = vpop.eup %705 }
 0x236   :  { %v435_v7 = vmul.f32 %v706_v6, %v411_v4 }
 0x238   :  { %473 = vperm.xlu1 %689, %v435_v7  }
 0x23c   :  { %524 = vperm.xlu1 %689, %v490_v8  }
 0x297   :  { %v439_v15 = vpop.permute.xlu0 %438 }
 0x298   :  { %v476_v16 = vmul.f32 %v439_v15, %v1033_v34 }
 0x29a   :  { %v532_v17 = vadd.f32 %v495_v10, %v476_v16 }
 0x29b   :  { %v444_v18 = vpop.permute.xlu1 %443 }
 0x29c   :  { %vm540_vm1 = vcmp.ge.f32.partialorder %v532_v17, 0.0  ;;  %v548_v19 = vmul.f32 0.2, %v532_v17  ;;  %v477_v20 = vmul.f32 %v444_v18, %v1037_v38 }
 0x29e   :  { %v556_v21 = vsel %vm540_vm1, %v532_v17, %v548_v19  ;;  %v533_v22 = vadd.f32 %v500_v9, %v477_v20 }
 0x29f   :  { %564 = vst.msk [vmem:[%s1165_s4] sm:$0xff] %vm323_vm0, %v556_v21  ;;  %v449_v23 = vpop.permute.xlu1 %448 }
 0x2a0   :  { %vm541_vm2 = vcmp.ge.f32.partialorder %v533_v22, 0.0  ;;  %v549_v24 = vmul.f32 0.2, %v533_v22  ;;  %v478_v25 = vmul.f32 %v449_v23, %v1042_v44 }
 0x2a2   :  { %v557_v26 = vsel %vm541_vm2, %v533_v22, %v549_v24  ;;  %v534_v34 = vadd.f32 %v505_v12, %v478_v25 }
 0x2a3   :  { %565 = vst.msk [vmem:[%s1165_s4 + $0x8] sm:$0xff] %vm323_vm0, %v557_v26  ;;  %v454_v38 = vpop.permute.xlu1 %453 }
 0x2a4   :  { %vm542_vm3 = vcmp.ge.f32.partialorder %v534_v34, 0.0  ;;  %v550_v27 = vmul.f32 0.2, %v534_v34  ;;  %v479_v28 = vmul.f32 %v454_v38, %v1047_v48 }
 0x2a6   :  { %v558_v29 = vsel %vm542_vm3, %v534_v34, %v550_v27  ;;  %v535_v30 = vadd.f32 %v510_v11, %v479_v28 }
 0x2a7   :  { %566 = vst.msk [vmem:[%s1165_s4 + $0x10] sm:$0xff] %vm323_vm0, %v558_v29  ;;  %v459_v44 = vpop.permute.xlu1 %458 }
 0x2a8   :  { %vm543_vm4 = vcmp.ge.f32.partialorder %v535_v30, 0.0  ;;  %v551_v31 = vmul.f32 0.2, %v535_v30  ;;  %v480_v32 = vmul.f32 %v459_v44, %v1052_v53 }
 0x2aa   :  { %v559_v33 = vsel %vm543_vm4, %v535_v30, %v551_v31  ;;  %v536_v35 = vadd.f32 %v515_v14, %v480_v32 }
 0x2ab   :  { %567 = vst.msk [vmem:[%s1165_s4 + $0x18] sm:$0xff] %vm323_vm0, %v559_v33  ;;  %v464_v48 = vpop.permute.xlu1 %463 }
 0x2ac   :  { %vm544_vm5 = vcmp.ge.f32.partialorder %v536_v35, 0.0  ;;  %v552_v36 = vmul.f32 0.2, %v536_v35  ;;  %v481_v37 = vmul.f32 %v464_v48, %v1057_v59  ;;  %v530_v59 = vpop.permute.xlu0 %529 }
 0x2ae   :  { %v560_v39 = vsel %vm544_vm5, %v536_v35, %v552_v36  ;;  %v537_v41 = vadd.f32 %v520_v13, %v481_v37 }
 0x2af   :  { %568 = vst.msk [vmem:[%s1165_s4 + $0x20] sm:$0xff] %vm323_vm0, %v560_v39  ;;  %v469_v53 = vpop.permute.xlu1 %468 }
 0x2b0   :  { %vm545_vm6 = vcmp.ge.f32.partialorder %v537_v41, 0.0  ;;  %v553_v42 = vmul.f32 0.2, %v537_v41  ;;  %v482_v46 = vmul.f32 %v469_v53, %v1062_v0 }
 0x2b2   :  { %v561_v43 = vsel %vm545_vm6, %v537_v41, %v553_v42 }
 0x2b3   :  { %569 = vst.msk [vmem:[%s1165_s4 + $0x28] sm:$0xff] %vm323_vm0, %v561_v43  ;;  %v474_v40 = vpop.permute.xlu1 %473 }
 0x2b4   :  { %v483_v45 = vmul.f32 %v474_v40, %v1067_v5 }
 0x2b6   :  { %v539_v47 = vadd.f32 %v530_v59, %v483_v45 }
 0x2b7   :  { %v525_v49 = vpop.permute.xlu1 %524 }
 0x2b8   :  { %vm547_vm7 = vcmp.ge.f32.partialorder %v539_v47, 0.0  ;;  %v555_v50 = vmul.f32 0.2, %v539_v47  ;;  %v538_v51 = vadd.f32 %v525_v49, %v482_v46 }
 0x2ba   :  { %v563_v52 = vsel %vm547_vm7, %v539_v47, %v555_v50  ;;  %vm546_vm8 = vcmp.ge.f32.partialorder %v538_v51, 0.0  ;;  %v554_v54 = vmul.f32 0.2, %v538_v51 }
 0x2bb   :  { %571 = vst.msk [vmem:[%s1165_s4 + $0x38] sm:$0xff] %vm323_vm0, %v563_v52 }
 0x2bc   :  { %v562_v55 = vsel %vm546_vm8, %v538_v51, %v554_v54 }
 0x2bd   :  { %570 = vst.msk [vmem:[%s1165_s4 + $0x30] sm:$0xff] %vm323_vm0, %v562_v55 }

// kernel: discriminator_forward.9
= control target key start
LH: loop header
LB: loop body
LE: loop exit
PB: predicated region body
PF: predicated region fallthrough
CT: control target
= control target key end

     0   :  { %v142_v38 = vlaneseq  ;;  %s1078_s0 = inlined_call_operand.vmem [shape: f32[1024,2], index: 0, kind: input, shape index: {}]   ;;  %s1079_s1 = inlined_call_operand.vmem [shape: f32[1,1024], index: 1, kind: input, shape index: {}]   ;;  %s1080_s2 = inlined_call_operand.hbm [shape: f32[1,2], index: 2, kind: output, shape index: {}]  }
   0x1   :  { %v44_v0 = vld [vmem:[%s1078_s0 + $0xf8] sm:$0xff]  ;;  %v43_v4 = vld [vmem:[%s1078_s0 + $0xf0] sm:$0xff]  ;;  %v42_v8 = vld [vmem:[%s1078_s0 + $0xe8] sm:$0xff] }
   0x2   :  { %v76_v1 = vld [vmem:[%s1078_s0 + $0x1f8] sm:$0xff]  ;;  %485 = vmatprep.subr.mxu0 %v44_v0  ;;  %v75_v5 = vld [vmem:[%s1078_s0 + $0x1f0] sm:$0xff]  ;;  %v74_v9 = vld [vmem:[%s1078_s0 + $0x1e8] sm:$0xff]  ;;  %v806_v47 = vshrl.u32 %v142_v38, 7 }
   0x3   :  { %v28_v2 = vld [vmem:[%s1078_s0 + $0x78] sm:$0xff]  ;;  %520 = vmatprep.subr.mxu1 %v76_v1  ;;  %v27_v6 = vld [vmem:[%s1078_s0 + $0x70] sm:$0xff]  ;;  %v26_v10 = vld [vmem:[%s1078_s0 + $0x68] sm:$0xff] }
   0x4   :  { %v60_v3 = vld [vmem:[%s1078_s0 + $0x178] sm:$0xff]  ;;  %486 = vmatpush3.msra.mxu0 %v28_v2  ;;  %v59_v7 = vld [vmem:[%s1078_s0 + $0x170] sm:$0xff]  ;;  %v58_v11 = vld [vmem:[%s1078_s0 + $0x168] sm:$0xff]  ;;  %v148_v56 = vsub.s32 1, %v806_v47  ;;  %v156_v60 = vsub.s32 3, %v806_v47  ;;  %v144_v63 = vsub.s32 0, %v806_v47 }
   0x5   :  { %521 = vmatpush3.msra.mxu1 %v60_v3  ;;  %487 = vmatprep.subr.mxu0 %v43_v4  ;;  %v41_v12 = vld [vmem:[%s1078_s0 + $0xe0] sm:$0xff]  ;;  %v40_v16 = vld [vmem:[%s1078_s0 + $0xd8] sm:$0xff]  ;;  %v39_v20 = vld [vmem:[%s1078_s0 + $0xd0] sm:$0xff]  ;;  %v152_v0 = vsub.s32 2, %v806_v47 }
   0x6   :  { %522 = vmatprep.subr.mxu1 %v75_v5  ;;  %488 = vmatpush3.msra.mxu0 %v27_v6  ;;  %v73_v13 = vld [vmem:[%s1078_s0 + $0x1e0] sm:$0xff]  ;;  %v72_v17 = vld [vmem:[%s1078_s0 + $0x1d8] sm:$0xff]  ;;  %v71_v21 = vld [vmem:[%s1078_s0 + $0x1d0] sm:$0xff] }
   0x7   :  { %523 = vmatpush3.msra.mxu1 %v59_v7  ;;  %489 = vmatprep.subr.mxu0 %v42_v8  ;;  %v25_v14 = vld [vmem:[%s1078_s0 + $0x60] sm:$0xff]  ;;  %v24_v18 = vld [vmem:[%s1078_s0 + $0x58] sm:$0xff]  ;;  %v23_v22 = vld [vmem:[%s1078_s0 + $0x50] sm:$0xff] }
   0x8   :  { %524 = vmatprep.subr.mxu1 %v74_v9  ;;  %v57_v15 = vld [vmem:[%s1078_s0 + $0x160] sm:$0xff]  ;;  %490 = vmatpush3.msra.mxu0 %v26_v10  ;;  %v56_v19 = vld [vmem:[%s1078_s0 + $0x158] sm:$0xff]  ;;  %v55_v23 = vld [vmem:[%s1078_s0 + $0x150] sm:$0xff] }
   0x9   :  { %525 = vmatpush3.msra.mxu1 %v58_v11  ;;  %491 = vmatprep.subr.mxu0 %v41_v12  ;;  %v38_v24 = vld [vmem:[%s1078_s0 + $0xc8] sm:$0xff]  ;;  %v37_v28 = vld [vmem:[%s1078_s0 + $0xc0] sm:$0xff]  ;;  %v36_v32 = vld [vmem:[%s1078_s0 + $0xb8] sm:$0xff] }
   0xa   :  { %526 = vmatprep.subr.mxu1 %v73_v13  ;;  %492 = vmatpush3.msra.mxu0 %v25_v14  ;;  %v70_v25 = vld [vmem:[%s1078_s0 + $0x1c8] sm:$0xff]  ;;  %v69_v29 = vld [vmem:[%s1078_s0 + $0x1c0] sm:$0xff]  ;;  %v68_v33 = vld [vmem:[%s1078_s0 + $0x1b8] sm:$0xff] }
   0xb   :  { %527 = vmatpush3.msra.mxu1 %v57_v15  ;;  %493 = vmatprep.subr.mxu0 %v40_v16  ;;  %v22_v26 = vld [vmem:[%s1078_s0 + $0x48] sm:$0xff]  ;;  %v21_v30 = vld [vmem:[%s1078_s0 + $0x40] sm:$0xff]  ;;  %v20_v34 = vld [vmem:[%s1078_s0 + $0x38] sm:$0xff] }
   0xc   :  { %528 = vmatprep.subr.mxu1 %v72_v17  ;;  %494 = vmatpush3.msra.mxu0 %v24_v18  ;;  %v54_v27 = vld [vmem:[%s1078_s0 + $0x148] sm:$0xff]  ;;  %v53_v31 = vld [vmem:[%s1078_s0 + $0x140] sm:$0xff]  ;;  %v52_v35 = vld [vmem:[%s1078_s0 + $0x138] sm:$0xff] }
   0xd   :  { %529 = vmatpush3.msra.mxu1 %v56_v19  ;;  %495 = vmatprep.subr.mxu0 %v39_v20  ;;  %v35_v36 = vld [vmem:[%s1078_s0 + $0xb0] sm:$0xff]  ;;  %v34_v41 = vld [vmem:[%s1078_s0 + $0xa8] sm:$0xff]  ;;  %v33_v45 = vld [vmem:[%s1078_s0 + $0xa0] sm:$0xff] }
   0xe   :  { %530 = vmatprep.subr.mxu1 %v71_v21  ;;  %496 = vmatpush3.msra.mxu0 %v23_v22  ;;  %v67_v37 = vld [vmem:[%s1078_s0 + $0x1b0] sm:$0xff]  ;;  %v66_v42 = vld [vmem:[%s1078_s0 + $0x1a8] sm:$0xff]  ;;  %v65_v46 = vld [vmem:[%s1078_s0 + $0x1a0] sm:$0xff] }
   0xf   :  { %531 = vmatpush3.msra.mxu1 %v55_v23  ;;  %497 = vmatprep.subr.mxu0 %v38_v24  ;;  %v19_v39 = vld [vmem:[%s1078_s0 + $0x30] sm:$0xff]  ;;  %v18_v43 = vld [vmem:[%s1078_s0 + $0x28] sm:$0xff]  ;;  %v17_v48 = vld [vmem:[%s1078_s0 + $0x20] sm:$0xff] }
  0x10   :  { %532 = vmatprep.subr.mxu1 %v70_v25  ;;  %498 = vmatpush3.msra.mxu0 %v22_v26  ;;  %v51_v40 = vld [vmem:[%s1078_s0 + $0x130] sm:$0xff]  ;;  %v50_v44 = vld [vmem:[%s1078_s0 + $0x128] sm:$0xff]  ;;  %v49_v49 = vld [vmem:[%s1078_s0 + $0x120] sm:$0xff] }
  0x11   :  { %533 = vmatpush3.msra.mxu1 %v54_v27  ;;  %499 = vmatprep.subr.mxu0 %v37_v28  ;;  %v32_v50 = vld [vmem:[%s1078_s0 + $0x98] sm:$0xff]  ;;  %v31_v54 = vld [vmem:[%s1078_s0 + $0x90] sm:$0xff]  ;;  %v842_v59 = vld [vmem:[%s1079_s1] sm:$0xff] }
  0x12   :  { %534 = vmatprep.subr.mxu1 %v69_v29  ;;  %500 = vmatpush3.msra.mxu0 %v21_v30  ;;  %v64_v51 = vld [vmem:[%s1078_s0 + $0x198] sm:$0xff]  ;;  %v63_v55 = vld [vmem:[%s1078_s0 + $0x190] sm:$0xff]  ;;  %v30_v61 = vld [vmem:[%s1078_s0 + $0x88] sm:$0xff]  ;;  %v149_v5 = vrot.slane %v842_v59, %v148_v56  ;;  %v157_v7 = vrot.slane %v842_v59, %v156_v60  ;;  %v145_v9 = vrot.slane %v842_v59, %v144_v63 }
  0x13   :  { %535 = vmatpush3.msra.mxu1 %v53_v31  ;;  %501 = vmatprep.subr.mxu0 %v36_v32  ;;  %v16_v52 = vld [vmem:[%s1078_s0 + $0x18] sm:$0xff]  ;;  %v15_v57 = vld [vmem:[%s1078_s0 + $0x10] sm:$0xff]  ;;  %v62_v62 = vld [vmem:[%s1078_s0 + $0x188] sm:$0xff]  ;;  %v153_v10 = vrot.slane %v842_v59, %v152_v0 }
  0x14   :  { %536 = vmatprep.subr.mxu1 %v68_v33  ;;  %502 = vmatpush3.msra.mxu0 %v20_v34  ;;  %v48_v53 = vld [vmem:[%s1078_s0 + $0x118] sm:$0xff]  ;;  %v47_v58 = vld [vmem:[%s1078_s0 + $0x110] sm:$0xff]  ;;  %v14_v1 = vld [vmem:[%s1078_s0 + $0x8] sm:$0xff] }
  0x15   :  { %537 = vmatpush3.msra.mxu1 %v52_v35  ;;  %503 = vmatprep.subr.mxu0 %v35_v36  ;;  %v46_v2 = vld [vmem:[%s1078_s0 + $0x108] sm:$0xff]  ;;  %v29_v3 = vld [vmem:[%s1078_s0 + $0x80] sm:$0xff]  ;;  %v108_v11 = vld [vmem:[%s1078_s0 + $0x2f8] sm:$0xff] }
  0x16   :  { %538 = vmatprep.subr.mxu1 %v67_v37  ;;  %504 = vmatpush3.msra.mxu0 %v19_v39  ;;  %v61_v4 = vld [vmem:[%s1078_s0 + $0x180] sm:$0xff]  ;;  %v140_v12 = vld [vmem:[%s1078_s0 + $0x3f8] sm:$0xff]  ;;  %v107_v15 = vld [vmem:[%s1078_s0 + $0x2f0] sm:$0xff] }
  0x17   :  { %539 = vmatpush3.msra.mxu1 %v51_v40  ;;  %505 = vmatprep.subr.mxu0 %v34_v41  ;;  %v13_v6 = vld [vmem:[%s1078_s0] sm:$0xff]  ;;  %v92_v13 = vld [vmem:[%s1078_s0 + $0x278] sm:$0xff]  ;;  %v139_v16 = vld [vmem:[%s1078_s0 + $0x3f0] sm:$0xff] }
  0x18   :  { %540 = vmatprep.subr.mxu1 %v66_v42  ;;  %506 = vmatpush3.msra.mxu0 %v18_v43  ;;  %v45_v8 = vld [vmem:[%s1078_s0 + $0x100] sm:$0xff]  ;;  %v124_v14 = vld [vmem:[%s1078_s0 + $0x378] sm:$0xff]  ;;  %v91_v17 = vld [vmem:[%s1078_s0 + $0x270] sm:$0xff] }
  0x19   :  { %541 = vmatpush3.msra.mxu1 %v50_v44  ;;  %507 = vmatprep.subr.mxu0 %v33_v45  ;;  %v123_v18 = vld [vmem:[%s1078_s0 + $0x370] sm:$0xff]  ;;  %v106_v19 = vld [vmem:[%s1078_s0 + $0x2e8] sm:$0xff]  ;;  %v105_v23 = vld [vmem:[%s1078_s0 + $0x2e0] sm:$0xff] }
  0x1a   :  { %542 = vmatprep.subr.mxu1 %v65_v46  ;;  %508 = vmatpush3.msra.mxu0 %v17_v48  ;;  %v138_v20 = vld [vmem:[%s1078_s0 + $0x3e8] sm:$0xff]  ;;  %v137_v24 = vld [vmem:[%s1078_s0 + $0x3e0] sm:$0xff]  ;;  %v104_v27 = vld [vmem:[%s1078_s0 + $0x2d8] sm:$0xff] }
  0x1b   :  { %543 = vmatpush3.msra.mxu1 %v49_v49  ;;  %509 = vmatprep.subr.mxu0 %v32_v50  ;;  %v90_v21 = vld [vmem:[%s1078_s0 + $0x268] sm:$0xff]  ;;  %v89_v25 = vld [vmem:[%s1078_s0 + $0x260] sm:$0xff]  ;;  %v136_v28 = vld [vmem:[%s1078_s0 + $0x3d8] sm:$0xff] }
  0x1c   :  { %544 = vmatprep.subr.mxu1 %v64_v51  ;;  %510 = vmatpush3.msra.mxu0 %v16_v52  ;;  %v122_v22 = vld [vmem:[%s1078_s0 + $0x368] sm:$0xff]  ;;  %v121_v26 = vld [vmem:[%s1078_s0 + $0x360] sm:$0xff]  ;;  %v88_v29 = vld [vmem:[%s1078_s0 + $0x258] sm:$0xff] }
  0x1d   :  { %545 = vmatpush3.msra.mxu1 %v48_v53  ;;  %511 = vmatprep.subr.mxu0 %v31_v54  ;;  %v120_v30 = vld [vmem:[%s1078_s0 + $0x358] sm:$0xff]  ;;  %v103_v31 = vld [vmem:[%s1078_s0 + $0x2d0] sm:$0xff] }
  0x1e   :  { %546 = vmatprep.subr.mxu1 %v63_v55  ;;  %512 = vmatpush3.msra.mxu0 %v15_v57  ;;  %v135_v32 = vld [vmem:[%s1078_s0 + $0x3d0] sm:$0xff] }
  0x1f   :  { %547 = vmatpush3.msra.mxu1 %v47_v58  ;;  %513 = vmatprep.subr.mxu0 %v30_v61  ;;  %v87_v33 = vld [vmem:[%s1078_s0 + $0x250] sm:$0xff] }
  0x20   :  { %548 = vmatprep.subr.mxu1 %v62_v62  ;;  %514 = vmatpush3.msra.mxu0 %v14_v1  ;;  %v119_v34 = vld [vmem:[%s1078_s0 + $0x350] sm:$0xff] }
  0x21   :  { %549 = vmatpush3.msra.mxu1 %v46_v2  ;;  %515 = vmatprep.subr.mxu0 %v29_v3 }
  0x22   :  { %550 = vmatprep.subr.mxu1 %v61_v4  ;;  %516 = vmatpush3.msra.mxu0 %v13_v6 }
  0x23   :  { %246 = vmatprep.mubr.f32.mxu0 %v149_v5  ;;  %551 = vmatpush3.msra.mxu1 %v45_v8 }
  0x24   :  { %316 = vmatprep.mubr.f32.mxu1 %v157_v7  ;;  %247 = vmatmul.mubr.f32.vlgmr.msra.gmra.mxu0 %v145_v9 }
  0x25   :  { %317 = vmatmul.mubr.f32.vlgmr.msra.gmra.mxu1 %v153_v10  ;;  %555 = vmatprep.subr.mxu0 %v108_v11 }
  0x26   :  { %590 = vmatprep.subr.mxu1 %v140_v12  ;;  %556 = vmatpush3.msra.mxu0 %v92_v13 }
  0x27   :  { %591 = vmatpush3.msra.mxu1 %v124_v14  ;;  %557 = vmatprep.subr.mxu0 %v107_v15 }
  0x28   :  { %592 = vmatprep.subr.mxu1 %v139_v16  ;;  %558 = vmatpush3.msra.mxu0 %v91_v17 }
  0x29   :  { %593 = vmatpush3.msra.mxu1 %v123_v18  ;;  %559 = vmatprep.subr.mxu0 %v106_v19 }
  0x2a   :  { %594 = vmatprep.subr.mxu1 %v138_v20  ;;  %560 = vmatpush3.msra.mxu0 %v90_v21 }
  0x2b   :  { %595 = vmatpush3.msra.mxu1 %v122_v22  ;;  %561 = vmatprep.subr.mxu0 %v105_v23 }
  0x2c   :  { %596 = vmatprep.subr.mxu1 %v137_v24  ;;  %562 = vmatpush3.msra.mxu0 %v89_v25 }
  0x2d   :  { %597 = vmatpush3.msra.mxu1 %v121_v26  ;;  %563 = vmatprep.subr.mxu0 %v104_v27 }
  0x2e   :  { %598 = vmatprep.subr.mxu1 %v136_v28 }
  0x2f   :  { %7 = vsyncpa [#allocation3], 0  ;;  %564 = vmatpush3.msra.mxu0 %v88_v29  ;;  %599 = vmatpush3.msra.mxu1 %v120_v30  ;;  %v102_v35 = vld [vmem:[%s1078_s0 + $0x2c8] sm:$0xff]  ;;  %v101_v39 = vld [vmem:[%s1078_s0 + $0x2c0] sm:$0xff]  ;;  %v164_v3 = vsub.s32 5, %v806_v47  ;;  %v172_v6 = vsub.s32 7, %v806_v47 }
  0x30   :  { %v134_v36 = vld [vmem:[%s1078_s0 + $0x3c8] sm:$0xff]  ;;  %565 = vmatprep.subr.mxu0 %v103_v31  ;;  %600 = vmatprep.subr.mxu1 %v135_v32  ;;  %v133_v40 = vld [vmem:[%s1078_s0 + $0x3c0] sm:$0xff]  ;;  %v100_v43 = vld [vmem:[%s1078_s0 + $0x2b8] sm:$0xff]  ;;  %v160_v9 = vsub.s32 4, %v806_v47  ;;  %v168_v10 = vsub.s32 6, %v806_v47  ;;  %vm468_vm0 = vcmask 8192  }
  0x31   :  { %v86_v37 = vld [vmem:[%s1078_s0 + $0x248] sm:$0xff]  ;;  %566 = vmatpush3.msra.mxu0 %v87_v33  ;;  %601 = vmatpush3.msra.mxu1 %v119_v34  ;;  %v85_v41 = vld [vmem:[%s1078_s0 + $0x240] sm:$0xff]  ;;  %v132_v44 = vld [vmem:[%s1078_s0 + $0x3b8] sm:$0xff]  ;;  %v165_v14 = vrot.slane %v842_v59, %v164_v3  ;;  %v173_v16 = vrot.slane %v842_v59, %v172_v6 }
  0x32   :  { %v118_v38 = vld [vmem:[%s1078_s0 + $0x348] sm:$0xff]  ;;  %567 = vmatprep.subr.mxu0 %v102_v35  ;;  %602 = vmatprep.subr.mxu1 %v134_v36  ;;  %v117_v42 = vld [vmem:[%s1078_s0 + $0x340] sm:$0xff]  ;;  %v84_v45 = vld [vmem:[%s1078_s0 + $0x238] sm:$0xff]  ;;  %v161_v18 = vrot.slane %v842_v59, %v160_v9  ;;  %v169_v19 = vrot.slane %v842_v59, %v168_v10 }
  0x33   :  { %568 = vmatpush3.msra.mxu0 %v86_v37  ;;  %603 = vmatpush3.msra.mxu1 %v118_v38  ;;  %v116_v46 = vld [vmem:[%s1078_s0 + $0x338] sm:$0xff]  ;;  %v99_v48 = vld [vmem:[%s1078_s0 + $0x2b0] sm:$0xff]  ;;  %v98_v52 = vld [vmem:[%s1078_s0 + $0x2a8] sm:$0xff] }
  0x34   :  { %569 = vmatprep.subr.mxu0 %v101_v39  ;;  %604 = vmatprep.subr.mxu1 %v133_v40  ;;  %v131_v49 = vld [vmem:[%s1078_s0 + $0x3b0] sm:$0xff]  ;;  %v130_v53 = vld [vmem:[%s1078_s0 + $0x3a8] sm:$0xff]  ;;  %v97_v56 = vld [vmem:[%s1078_s0 + $0x2a0] sm:$0xff] }
  0x35   :  { %570 = vmatpush3.msra.mxu0 %v85_v41  ;;  %605 = vmatpush3.msra.mxu1 %v117_v42  ;;  %v83_v50 = vld [vmem:[%s1078_s0 + $0x230] sm:$0xff]  ;;  %v82_v54 = vld [vmem:[%s1078_s0 + $0x228] sm:$0xff]  ;;  %v129_v57 = vld [vmem:[%s1078_s0 + $0x3a0] sm:$0xff] }
  0x36   :  { %571 = vmatprep.subr.mxu0 %v100_v43  ;;  %606 = vmatprep.subr.mxu1 %v132_v44  ;;  %v115_v51 = vld [vmem:[%s1078_s0 + $0x330] sm:$0xff]  ;;  %v114_v55 = vld [vmem:[%s1078_s0 + $0x328] sm:$0xff]  ;;  %v81_v58 = vld [vmem:[%s1078_s0 + $0x220] sm:$0xff] }
  0x37   :  { %572 = vmatpush3.msra.mxu0 %v84_v45  ;;  %607 = vmatpush3.msra.mxu1 %v116_v46  ;;  %v113_v60 = vld [vmem:[%s1078_s0 + $0x320] sm:$0xff]  ;;  %v96_v61 = vld [vmem:[%s1078_s0 + $0x298] sm:$0xff]  ;;  %v95_v1 = vld [vmem:[%s1078_s0 + $0x290] sm:$0xff] }
  0x38   :  { %573 = vmatprep.subr.mxu0 %v99_v48  ;;  %608 = vmatprep.subr.mxu1 %v131_v49  ;;  %v128_v62 = vld [vmem:[%s1078_s0 + $0x398] sm:$0xff]  ;;  %v127_v2 = vld [vmem:[%s1078_s0 + $0x390] sm:$0xff]  ;;  %v94_v7 = vld [vmem:[%s1078_s0 + $0x288] sm:$0xff] }
  0x39   :  { %574 = vmatpush3.msra.mxu0 %v83_v50  ;;  %609 = vmatpush3.msra.mxu1 %v115_v51  ;;  %v80_v63 = vld [vmem:[%s1078_s0 + $0x218] sm:$0xff]  ;;  %v79_v4 = vld [vmem:[%s1078_s0 + $0x210] sm:$0xff]  ;;  %v126_v8 = vld [vmem:[%s1078_s0 + $0x388] sm:$0xff] }
  0x3a   :  { %575 = vmatprep.subr.mxu0 %v98_v52  ;;  %610 = vmatprep.subr.mxu1 %v130_v53  ;;  %v112_v0 = vld [vmem:[%s1078_s0 + $0x318] sm:$0xff]  ;;  %v111_v5 = vld [vmem:[%s1078_s0 + $0x310] sm:$0xff]  ;;  %v78_v11 = vld [vmem:[%s1078_s0 + $0x208] sm:$0xff] }
  0x3b   :  { %576 = vmatpush3.msra.mxu0 %v82_v54  ;;  %611 = vmatpush3.msra.mxu1 %v114_v55  ;;  %v110_v12 = vld [vmem:[%s1078_s0 + $0x308] sm:$0xff]  ;;  %v93_v13 = vld [vmem:[%s1078_s0 + $0x280] sm:$0xff] }
  0x3c   :  { %577 = vmatprep.subr.mxu0 %v97_v56  ;;  %612 = vmatprep.subr.mxu1 %v129_v57  ;;  %v125_v47 = vld [vmem:[%s1078_s0 + $0x380] sm:$0xff] }
  0x3d   :  { %578 = vmatpush3.msra.mxu0 %v81_v58  ;;  %613 = vmatpush3.msra.mxu1 %v113_v60  ;;  %v77_v15 = vld [vmem:[%s1078_s0 + $0x200] sm:$0xff] }
  0x3e   :  { %579 = vmatprep.subr.mxu0 %v96_v61  ;;  %614 = vmatprep.subr.mxu1 %v128_v62  ;;  %v109_v17 = vld [vmem:[%s1078_s0 + $0x300] sm:$0xff]  ;;  %s652_s0 = smov [#allocation2]  }
  0x3f   :  { %580 = vmatpush3.msra.mxu0 %v80_v63  ;;  %615 = vmatpush3.msra.mxu1 %v112_v0  ;;  %s476_s10 = sshll.u32 %s652_s0, 4  ;;  %s477_s10 = int_to_ptr.vmem [resolvable:$true] %s476_s10 }
  0x40   :  { %581 = vmatprep.subr.mxu0 %v95_v1  ;;  %616 = vmatprep.subr.mxu1 %v127_v2  ;;  %s630_s11 = scalar_lea.vmem %s477_s10, 16  ;;  %s634_s12 = scalar_lea.vmem %s477_s10, 32 }
  0x41   :  { %582 = vmatpush3.msra.mxu0 %v79_v4  ;;  %617 = vmatpush3.msra.mxu1 %v111_v5  ;;  %p631_p0 = scmp.ne.s32.totalorder %s477_s10, %s630_s11  ;;  %p635_p1 = scmp.lt.s32.totalorder %s477_s10, %s477_s10 }
  0x42   :  { %583 = vmatprep.subr.mxu0 %v94_v7  ;;  %618 = vmatprep.subr.mxu1 %v126_v8  ;;  %p636_p2 = scmp.lt.s32.totalorder %s634_s12, %s630_s11 }
  0x43   :  { %584 = vmatpush3.msra.mxu0 %v78_v11  ;;  %619 = vmatpush3.msra.mxu1 %v110_v12 }
  0x44   :  { %585 = vmatprep.subr.mxu0 %v93_v13  ;;  %620 = vmatprep.subr.mxu1 %v125_v47  ;;  %p637_p3 = por %p636_p2, %p635_p1 }
  0x45   :  { %586 = vmatpush3.msra.mxu0 %v77_v15  ;;  %386 = vmatprep.mubr.f32.mxu0 %v165_v14 }
  0x46   :  { %621 = vmatpush3.msra.mxu1 %v109_v17  ;;  %456 = vmatprep.mubr.f32.mxu1 %v173_v16  ;;  %p638_p4 = pnand %p637_p3, %p631_p0 }
  0x47   :  { %387 = vmatmul.mubr.f32.vlgmr.msra.gmra.mxu0 %v161_v18  ;;  %457 = vmatmul.mubr.f32.vlgmr.msra.gmra.mxu1 %v169_v19 }
  0xe4   :  { %v517_v20 = vpop.f32.mrf.mxu0 }
  0xe5   :  { %v552_v21 = vpop.f32.mrf.mxu1 }
  0xe6   :  { %v518_v22 = vpop.f32.mrf.mxu0 }
  0xe7   :  { %v553_v23 = vpop.f32.mrf.mxu1  ;;  %v519_v24 = vadd.f32 %v518_v22, %v517_v20 }
  0xe8   :  { %v554_v25 = vadd.f32 %v553_v23, %v552_v21 }
  0xea   :  { %v319_v30 = vadd.f32 %v554_v25, %v519_v24 }
 0x107   :  { %v587_v26 = vpop.f32.mrf.mxu0  ;;  %v622_v27 = vpop.f32.mrf.mxu1 }
 0x109   :  { %v588_v28 = vpop.f32.mrf.mxu0  ;;  %v623_v29 = vpop.f32.mrf.mxu1 }
 0x10a   :  { %v589_v59 = vadd.f32 %v588_v28, %v587_v26  ;;  %v624_v32 = vadd.f32 %v623_v29, %v622_v27 }
 0x10c   :  { %v389_v31 = vadd.f32 %v589_v59, %v319_v30 }
 0x10e   :  { %v459_v33 = vadd.f32 %v624_v32, %v389_v31 }
 0x110   :  { %v484_v34 = vmul.f32 -1.442695, %v459_v33 }
 0x112   :  { %626 = vpow2.f32 %v484_v34 }
 0x11f   :  { %v627_v35 = vpop.eup %626 }
 0x120   :  { %v465_v36 = vadd.f32 1.0, %v627_v35 }
 0x122   :  { %628 = vrcp.f32 %v465_v36 }
 0x12f   :  { %v629_v37 = vpop.eup %628 }
 0x130   :  { %469 = vst.msk [vmem:[#allocation2] sm:$0x1] %vm468_vm0, %v629_v37 }
 0x131   :  { %641 = shalt.err (!%p638_p4)
}
 0x132   :  { %479 = dma.vmem_to_hbm [thread:$0]  %s477_s10, 16, %s1080_s2, [#allocation3]  }
 0x133   :  { %650 = dma.done.wait [#allocation3], 16  }
 0x134   :  { %651 = vsyncadd [#allocation3], 4294967280 }
 0x135   :  { %483 = vsyncpa [#allocation3], 1 }

</bundles_post_ra>
